<compile_context>
chip_gen: v7x
topology: tpu7x:2x2x1
jax: 0.10.0
libtpu: 0.0.40
codegen_flags: <defaults>
</compile_context>

<pallas_src>
import functools

import jax
import jax.numpy as jnp
from jax.experimental import pallas as pl
from jax.experimental.pallas import tpu as pltpu


def _round_up(x, m):
    return (x + m - 1) // m * m


def _device_kind():
    try:
        return jax.devices()[0].device_kind.lower()
    except Exception:  # pragma: no cover - defensive
        return ""


def _mxu_rows():
    # 128x128 MXU on v5e; 256x256 on v6e / v7x.
    return 128 if "v5" in _device_kind() else 256


def default_compute_dtype():
    # v5e has no bf16 VPU/EUP -> keep f32; bf16 (f32 accumulation) on v6e/v7x.
    return jnp.float32 if "v5" in _device_kind() else jnp.bfloat16


def _choose_tt(T, B, rows_target):
    """Timesteps folded per grid step: fill the MXU rows, keep grid >= 2."""
    tt = max(1, rows_target // max(B, 1))
    if T >= 2:
        # Ensure >= 2 grid steps so v7x's second TensorCore gets work.
        tt = min(tt, pl.cdiv(T, 2))
    return max(1, min(tt, T))


def _mlp_policy_kernel(x_ref, w1_ref, w2_ref, o_ref, *, obs_size, action_size,
                       h_pad, a_pad, tt, batch, approx_recip):
    """One grid step == TT complete forward passes, each on a [B, obs] batch.

    x_ref : [TT, B, obs_size]           (obs dtype = producer's choice)
    w1_ref: [obs_size + 1, h_pad]       rows [0:obs] = W1^T (padded), row obs = b1
    w2_ref: [h_pad + 1, a_pad]          rows [0:h_pad] = W2^T (padded), row h_pad = b2
    o_ref : [TT, B, action_size]        unpadded probabilities (f32)
    """
    dt = w1_ref.dtype          # compute dtype (bf16 on v6e/v7x path, f32 on v5e)
    rows = tt * batch          # B == 8 keeps this reshape sublane-aligned (free)

    # ---- layer 1: h = relu(obs @ W1 + b1), all TT timesteps at once -------
    x = x_ref[...].reshape(rows, obs_size)
    if x.dtype != dt:          # no-op when the producer already stores `dt`
        x = x.astype(dt)
    w1 = w1_ref[pl.ds(0, obs_size), :]                        # [obs, h_pad]
    b1 = w1_ref[pl.ds(obs_size, 1), :].astype(jnp.float32)    # [1, h_pad]
    h = jnp.dot(x, w1, preferred_element_type=jnp.float32) + b1
    h = jnp.maximum(h, 0.0)                                   # [rows, h_pad] f32

    # ---- layer 2: a = relu(h @ W2 + b2) ------------------------------------
    if h.dtype != dt:          # cast only on the bf16 path (skipped for f32/v5e)
        h = h.astype(dt)
    w2 = w2_ref[pl.ds(0, h_pad), :]                           # [h_pad, a_pad]
    b2 = w2_ref[pl.ds(h_pad, 1), :].astype(jnp.float32)       # [1, a_pad]
    a = jnp.dot(h, w2, preferred_element_type=jnp.float32) + b2
    a = jnp.maximum(a, 0.0)                                   # [rows, a_pad] f32

    # ---- per-timestep softmax over the batch axis (== torch softmax dim=0) -
    # Drop the lane padding BEFORE the epilogue; only real action columns are
    # reduced/stored, so the HBM writeback is the unpadded tensor.
    logits = a.reshape(tt, batch, a_pad)[:, :, :action_size]  # [tt, B, A]
    m = jnp.max(logits, axis=1, keepdims=True)                # [tt, 1, A]
    e = jnp.exp(logits - m)
    s = jnp.sum(e, axis=1, keepdims=True)
    if approx_recip:
        p = e * pl.reciprocal(s, approx=True)   # EUP slot, bf16-path only
    else:
        p = e / s                               # exact divide on f32 parity path
    o_ref[...] = p.astype(o_ref.dtype)
    # TODO(synk): if a downstream consumer (argmax / categorical sample /
    # log-prob) is known, fuse it here and return [TT, B] instead.


def prepare_params(w1, b1, w2, b2, compute_dtype=jnp.bfloat16):
    """One-time parameter prep (call ONCE, outside the per-step hot path).

    PyTorch nn.Linear layout in: w1 [32, obs], b1 [32], w2 [act, 32], b2 [act].
    Produces [in, out] weights padded to 128 lanes with the bias folded in as
    the trailing row, already in the compute dtype.
    """
    hidden, obs_size = w1.shape
    action_size = w2.shape[0]
    h_pad = _round_up(hidden, 128)
    a_pad = _round_up(action_size, 128)

    w1_aug = jnp.zeros((obs_size + 1, h_pad), jnp.float32)
    w1_aug = w1_aug.at[:obs_size, :hidden].set(jnp.asarray(w1, jnp.float32).T)
    w1_aug = w1_aug.at[obs_size, :hidden].set(jnp.asarray(b1, jnp.float32))

    w2_aug = jnp.zeros((h_pad + 1, a_pad), jnp.float32)
    w2_aug = w2_aug.at[:hidden, :action_size].set(jnp.asarray(w2, jnp.float32).T)
    w2_aug = w2_aug.at[h_pad, :action_size].set(jnp.asarray(b2, jnp.float32))

    return {
        "w1_aug": w1_aug.astype(compute_dtype),
        "w2_aug": w2_aug.astype(compute_dtype),
        "obs_size": obs_size,
        "hidden": hidden,
        "action_size": action_size,
        "h_pad": h_pad,
        "a_pad": a_pad,
    }


def mlp_policy_forward_batched(obs_tb, params, tt=None):
    """obs_tb: [T, B, obs_size] — T independent forward passes in one kernel
    call; each is softmaxed over its own batch axis (== torch softmax dim=0).
    Returns [T, B, action_size] float32 probabilities."""
    T, B, obs_size = obs_tb.shape
    assert obs_size == params["obs_size"]
    h_pad, a_pad = params["h_pad"], params["a_pad"]
    action_size = params["action_size"]

    if tt is None:
        tt = _choose_tt(T, B, _mxu_rows())
    tt = max(1, min(tt, T))

    T_pad = pl.cdiv(T, tt) * tt
    if T_pad != T:
        # One-time pad so the grid evenly tiles T; padded steps sliced off below.
        obs_tb = jnp.concatenate(
            [obs_tb, jnp.zeros((T_pad - T, B, obs_size), obs_tb.dtype)], axis=0)

    kernel = functools.partial(
        _mlp_policy_kernel, obs_size=obs_size, action_size=action_size,
        h_pad=h_pad, a_pad=a_pad, tt=tt, batch=B,
        approx_recip=(params["w1_aug"].dtype != jnp.float32))

    out = pl.pallas_call(
        kernel,
        out_shape=jax.ShapeDtypeStruct((T_pad, B, action_size), jnp.float32),
        grid=(T_pad // tt,),
        in_specs=[
            # TT timesteps of obs per block (TT complete forward batches)
            pl.BlockSpec((tt, B, obs_size), lambda t: (t, 0, 0)),
            # weights: constant index_map -> DMA'd once, resident in VMEM
            pl.BlockSpec((obs_size + 1, h_pad), lambda t: (0, 0)),
            pl.BlockSpec((h_pad + 1, a_pad), lambda t: (0, 0)),
        ],
        # Unpadded output block: no 32x-inflated writeback, no wrapper slice.
        out_specs=pl.BlockSpec((tt, B, action_size), lambda t: (t, 0, 0)),
        compiler_params=pltpu.CompilerParams(
            dimension_semantics=("parallel",)),  # shards T-blocks across v7x's 2 TCs
    )(obs_tb, params["w1_aug"], params["w2_aug"])

    return out if T_pad == T else out[:T]


def mlp_policy_forward(obs, params):
    """Single forward pass: obs [B, obs_size] -> [B, action_size]."""
    return mlp_policy_forward_batched(obs[None], params)[0]


def _reference(obs, w1, b1, w2, b2, compute_dtype):
    """Pure-JAX reference with the same quantization points as the kernel."""
    f32 = jnp.float32

    def q(v):
        return jnp.asarray(v, f32).astype(compute_dtype).astype(f32)

    h = jnp.maximum(q(obs) @ q(w1).T + q(b1), 0.0)
    a = jnp.maximum(q(h) @ q(w2).T + q(b2), 0.0)
    return jax.nn.softmax(a, axis=-2)  # softmax over the batch axis (dim=0)


if __name__ == "__main__":
    obs_size, hidden, action_size = 16, 32, 4
    batch, steps = 8, 64  # 64 rollout timesteps -> 2 (v6e/v7x) or 4 (v5e) grid steps

    key = jax.random.PRNGKey(0)
    k_obs, k_w1, k_b1, k_w2, k_b2 = jax.random.split(key, 5)

    obs = jax.random.normal(k_obs, (steps, batch, obs_size), dtype=jnp.float32)
    # PyTorch nn.Linear shapes: weight [out, in], bias [out].
    w1 = jax.random.normal(k_w1, (hidden, obs_size), dtype=jnp.float32) * 0.1
    b1 = jax.random.normal(k_b1, (hidden,), dtype=jnp.float32) * 0.1
    w2 = jax.random.normal(k_w2, (action_size, hidden), dtype=jnp.float32) * 0.1
    b2 = jax.random.normal(k_b2, (action_size,), dtype=jnp.float32) * 0.1

    # --- f32 path: exact PyTorch forward semantics --------------------------
    params_f32 = prepare_params(w1, b1, w2, b2, compute_dtype=jnp.float32)
    out_f32 = jax.block_until_ready(mlp_policy_forward_batched(obs, params_f32))
    ref_f32 = _reference(obs, w1, b1, w2, b2, jnp.float32)
    assert out_f32.shape == (steps, batch, action_size)
    assert jnp.allclose(out_f32, ref_f32, atol=1e-4, rtol=1e-4), "f32 mismatch"
    # softmax over dim=0: each (timestep, action) column sums to 1
    assert jnp.allclose(jnp.sum(out_f32, axis=1), 1.0, atol=1e-5), "col sums != 1"

    # single-forward convenience wrapper (T == 1)
    single = jax.block_until_ready(mlp_policy_forward(obs[0], params_f32))
    assert jnp.allclose(single, ref_f32[0], atol=1e-4, rtol=1e-4), "single mismatch"

    # ragged T (exercises the T-padding path; result still matches)
    out_rag = jax.block_until_ready(mlp_policy_forward_batched(obs[:51], params_f32))
    assert jnp.allclose(out_rag, ref_f32[:51], atol=1e-4, rtol=1e-4), "ragged mismatch"

    # --- recommended batched rollout path (bf16 on v6e/v7x, f32 on v5e) -----
    cdt = default_compute_dtype()
    params_fast = prepare_params(w1, b1, w2, b2, compute_dtype=cdt)
    obs_fast = obs.astype(cdt)  # producer-side cast: halves obs DMA on the bf16 path
    out_fast = jax.block_until_ready(
        mlp_policy_forward_batched(obs_fast, params_fast))
    ref_fast = _reference(obs, w1, b1, w2, b2, cdt)
    tol = 1e-4 if cdt == jnp.float32 else 3e-3
    assert jnp.allclose(out_fast, ref_fast, atol=tol, rtol=tol), "fast-path mismatch"

    print("KERNEL_OK")
</pallas_src>

<mosaic_0001>
module attributes {stable_mosaic.version = 11 : i64} {
  func.func @_mlp_policy_kernel(%arg0: i32, %arg1: memref<32x8x16xf32, #tpu.memory_space<vmem>>, %arg2: memref<17x128xf32, #tpu.memory_space<vmem>>, %arg3: memref<129x128xf32, #tpu.memory_space<vmem>>, %arg4: memref<32x8x4xf32, #tpu.memory_space<vmem>>) attributes {dimension_semantics = [#tpu.dimension_semantics<parallel>], iteration_bounds = array<i64: 2>, scalar_prefetch = 0 : i64, scratch_operands = 0 : i64, tpu.core_type = #tpu.core_type<tc>, window_params = [{transform_indices = @transform_0, window_bounds = array<i64: 32, 8, 16>}, {pipeline_mode = #tpu.pipeline_mode<synchronous>, transform_indices = @transform_1, window_bounds = array<i64: 17, 128>}, {pipeline_mode = #tpu.pipeline_mode<synchronous>, transform_indices = @transform_2, window_bounds = array<i64: 129, 128>}, {transform_indices = @transform_3, window_bounds = array<i64: 32, 8, 4>}]} {
    %c0 = arith.constant 0 : index
    %c0_0 = arith.constant 0 : index
    %c0_1 = arith.constant 0 : index
    %0 = vector.load %arg1[%c0, %c0_0, %c0_1] : memref<32x8x16xf32, #tpu.memory_space<vmem>>, vector<32x8x16xf32>
    %1 = vector.shape_cast %0 : vector<32x8x16xf32> to vector<256x16xf32>
    %c0_2 = arith.constant 0 : index
    %c0_3 = arith.constant 0 : index
    %2 = vector.load %arg2[%c0_2, %c0_3] : memref<17x128xf32, #tpu.memory_space<vmem>>, vector<16x128xf32>
    %c16 = arith.constant 16 : index
    %c0_4 = arith.constant 0 : index
    %3 = vector.load %arg2[%c16, %c0_4] : memref<17x128xf32, #tpu.memory_space<vmem>>, vector<1x128xf32>
    %cst = arith.constant dense<0.000000e+00> : vector<256x128xf32>
    %4 = tpu.matmul %1, %2, %cst {dimension_numbers = #tpu.dot_dimension_numbers<[1], [0], [0], [1], [0, 0, 1, 1], [], []>} : vector<256x16xf32>, vector<16x128xf32>, vector<256x128xf32> -> vector<256x128xf32>
    %5 = vector.broadcast %3 : vector<1x128xf32> to vector<256x128xf32>
    %6 = arith.addf %4, %5 : vector<256x128xf32>
    %cst_5 = arith.constant 0.000000e+00 : f32
    %7 = vector.broadcast %cst_5 : f32 to vector<256x128xf32>
    %8 = arith.maximumf %6, %7 : vector<256x128xf32>
    %c0_6 = arith.constant 0 : index
    %c0_7 = arith.constant 0 : index
    %9 = vector.load %arg3[%c0_6, %c0_7] : memref<129x128xf32, #tpu.memory_space<vmem>>, vector<128x128xf32>
    %c128 = arith.constant 128 : index
    %c0_8 = arith.constant 0 : index
    %10 = vector.load %arg3[%c128, %c0_8] : memref<129x128xf32, #tpu.memory_space<vmem>>, vector<1x128xf32>
    %cst_9 = arith.constant dense<0.000000e+00> : vector<256x128xf32>
    %11 = tpu.matmul %8, %9, %cst_9 {dimension_numbers = #tpu.dot_dimension_numbers<[1], [0], [0], [1], [0, 0, 1, 1], [], []>} : vector<256x128xf32>, vector<128x128xf32>, vector<256x128xf32> -> vector<256x128xf32>
    %12 = vector.broadcast %10 : vector<1x128xf32> to vector<256x128xf32>
    %13 = arith.addf %11, %12 : vector<256x128xf32>
    %cst_10 = arith.constant 0.000000e+00 : f32
    %14 = vector.broadcast %cst_10 : f32 to vector<256x128xf32>
    %15 = arith.maximumf %13, %14 : vector<256x128xf32>
    %16 = vector.shape_cast %15 : vector<256x128xf32> to vector<32x8x128xf32>
    %17 = vector.extract_strided_slice %16 {offsets = [0, 0, 0], sizes = [32, 8, 4], strides = [1, 1, 1]} : vector<32x8x128xf32> to vector<32x8x4xf32>
    %cst_11 = arith.constant dense<0xFF800000> : vector<32x4xf32>
    %18 = vector.multi_reduction <maximumf>, %17, %cst_11 [1] : vector<32x8x4xf32> to vector<32x4xf32>
    %19 = vector.shape_cast %18 : vector<32x4xf32> to vector<32x1x4xf32>
    %20 = vector.broadcast %19 : vector<32x1x4xf32> to vector<32x8x4xf32>
    %21 = arith.subf %17, %20 : vector<32x8x4xf32>
    %22 = math.exp %21 : vector<32x8x4xf32>
    %cst_12 = arith.constant dense<0.000000e+00> : vector<32x4xf32>
    %23 = vector.multi_reduction <add>, %22, %cst_12 [1] : vector<32x8x4xf32> to vector<32x4xf32>
    %24 = vector.shape_cast %23 : vector<32x4xf32> to vector<32x1x4xf32>
    %25 = vector.broadcast %24 : vector<32x1x4xf32> to vector<32x8x4xf32>
    %26 = arith.divf %22, %25 : vector<32x8x4xf32>
    %c0_13 = arith.constant 0 : index
    %c0_14 = arith.constant 0 : index
    %c0_15 = arith.constant 0 : index
    %27 = vector.load %arg4[%c0_13, %c0_14, %c0_15] : memref<32x8x4xf32, #tpu.memory_space<vmem>>, vector<32x8x4xf32>
    tpu.vector_store %arg4[%c0_13, %c0_14, %c0_15], %26 {strides = array<i32>} : memref<32x8x4xf32, #tpu.memory_space<vmem>>, vector<32x8x4xf32>,
    return
  }
  func.func @transform_0(%arg0: i32) -> (i32, i32, i32) {
    %c0_i32 = arith.constant 0 : i32
    %c0_i32_0 = arith.constant 0 : i32
    %c0_i32_1 = arith.constant 0 : i32
    return %arg0, %c0_i32, %c0_i32_0 : i32, i32, i32
  }
  func.func @transform_1(%arg0: i32) -> (i32, i32) {
    %c0_i32 = arith.constant 0 : i32
    %c0_i32_0 = arith.constant 0 : i32
    %c0_i32_1 = arith.constant 0 : i32
    return %c0_i32, %c0_i32_0 : i32, i32
  }
  func.func @transform_2(%arg0: i32) -> (i32, i32) {
    %c0_i32 = arith.constant 0 : i32
    %c0_i32_0 = arith.constant 0 : i32
    %c0_i32_1 = arith.constant 0 : i32
    return %c0_i32, %c0_i32_0 : i32, i32
  }
  func.func @transform_3(%arg0: i32) -> (i32, i32, i32) {
    %c0_i32 = arith.constant 0 : i32
    %c0_i32_0 = arith.constant 0 : i32
    %c0_i32_1 = arith.constant 0 : i32
    return %arg0, %c0_i32, %c0_i32_0 : i32, i32, i32
  }
}

</mosaic_0001>

<bundles_post_ra>
// kernel: tpu_custom_call.1
= control target key start
LH: loop header
LB: loop body
LE: loop exit
PB: predicated region body
PF: predicated region fallthrough
CT: control target
= control target key end

     0   :  { %s2018_s12 = smov 0   ;;  %s2750_s0 = inlined_call_operand.vmem [shape: f32[64,8,16], index: 0, kind: input, shape index: {}]   ;;  %s2751_s1 = inlined_call_operand.vmem [shape: f32[17,128], index: 1, kind: input, shape index: {}]   ;;  %s2752_s2 = inlined_call_operand.vmem [shape: f32[129,128], index: 2, kind: input, shape index: {}]   ;;  %s2753_s3 = inlined_call_operand.vmem [shape: f32[64,8,4], index: 3, kind: output, shape index: {}]  }
   0x1 LB: > { %s1542_s13 = sadd.s32 4294967295, %s1996_s12   ;;  %p1546_p0 = scmp.ge.s32.totalorder %s1996_s12, 1  ;;  %s1996_s12 = sphi %s2018_s12, %s13_s12  }
   0x2   : > { %p138_p1 = scmp.lt.s32.totalorder %s1996_s12, 3 }
   0x4   : > { %p139_p2 = pnand %p1546_p0, %p138_p1 }
   0x5   : > { %v206_v0 = vld [vmem:[%s2751_s1] sm:$0xff] (!%p139_p2)  ;;  %v207_v1 = vld [vmem:[%s2751_s1 + $0x8] sm:$0xff] (!%p139_p2)  ;;  %s1547_s18 = sshll.u32 (!%p139_p2), %s1542_s13, 5  ;;  %v569_v5 = vld [vmem:[%s2752_s2 + $0x10] sm:$0xff] (!%p139_p2)  ;;  %vm213_vm0 = vcmask (!%p139_p2), 130048   ;;  %vm845_vm1 = vcmask (!%p139_p2), 31744  }
   0x6   : > { %142 = sbr.rel (%p139_p2) target bundleno = 653 (0x28d), region = 32  ;;  %v567_v2 = vld [vmem:[%s2752_s2] sm:$0xff] (!%p139_p2)  ;;  %v1801_v3 = vpack.c.bf16 (!%p139_p2), %v207_v1, %v206_v0  ;;  %p163_p3 = scmp.lt.s32.totalorder (!%p139_p2), %s1547_s18, 63  ;;  %v568_v4 = vld [vmem:[%s2752_s2 + $0x8] sm:$0xff] (!%p139_p2)  ;;  %v570_v6 = vld [vmem:[%s2752_s2 + $0x18] sm:$0xff] (!%p139_p2) }
   0x7   : > { %v1805_v7 = vpack.c.bf16 (!%p139_p2), %v568_v4, %v567_v2  ;;  %v1809_v8 = vpack.c.bf16 (!%p139_p2), %v570_v6, %v569_v5  ;;  %v571_v9 = vld [vmem:[%s2752_s2 + $0x20] sm:$0xff] (!%p139_p2)  ;;  %v572_v10 = vld [vmem:[%s2752_s2 + $0x28] sm:$0xff] (!%p139_p2)  ;;  %v573_v16 = vld [vmem:[%s2752_s2 + $0x30] sm:$0xff] (!%p139_p2) }
   0x8   : > { %1802 = vmatprep.subr.bf16.mxu0 (!%p139_p2), %v1801_v3  ;;  %v1813_v14 = vpack.c.bf16 (!%p139_p2), %v572_v10, %v571_v9  ;;  %v574_v17 = vld [vmem:[%s2752_s2 + $0x38] sm:$0xff] (!%p139_p2)  ;;  %v575_v21 = vld [vmem:[%s2752_s2 + $0x40] sm:$0xff] (!%p139_p2)  ;;  %v576_v22 = vld [vmem:[%s2752_s2 + $0x48] sm:$0xff] (!%p139_p2) }
   0x9   : > { %1804 = vmatpush3.bf16.msra.mxu0 (!%p139_p2), %v1801_v3  ;;  %1837 = vmatprep.subr.bf16.mxu1 (!%p139_p2), %v1805_v7  ;;  %v1817_v19 = vpack.c.bf16 (!%p139_p2), %v574_v17, %v573_v16  ;;  %v1821_v24 = vpack.c.bf16 (!%p139_p2), %v576_v22, %v575_v21  ;;  %v577_v26 = vld [vmem:[%s2752_s2 + $0x50] sm:$0xff] (!%p139_p2)  ;;  %v578_v27 = vld [vmem:[%s2752_s2 + $0x58] sm:$0xff] (!%p139_p2)  ;;  %v579_v31 = vld [vmem:[%s2752_s2 + $0x60] sm:$0xff] (!%p139_p2) }
   0xa   : > { %1806 = vmatprep.subr.bf16.mxu0 (!%p139_p2), %v1805_v7  ;;  %1845 = vmatpush3.bf16.msra.mxu1 (!%p139_p2), %v1805_v7  ;;  %v1825_v29 = vpack.c.bf16 (!%p139_p2), %v578_v27, %v577_v26  ;;  %v580_v32 = vld [vmem:[%s2752_s2 + $0x68] sm:$0xff] (!%p139_p2)  ;;  %v581_v56 = vld [vmem:[%s2752_s2 + $0x70] sm:$0xff] (!%p139_p2)  ;;  %v582_v57 = vld [vmem:[%s2752_s2 + $0x78] sm:$0xff] (!%p139_p2) }
   0xb   : > { %1838 = vmatprep.subr.bf16.mxu1 (!%p139_p2), %v1809_v8  ;;  %v1829_v34 = vpack.c.bf16 (!%p139_p2), %v580_v32, %v579_v31  ;;  %v1833_v58 = vpack.c.bf16 (!%p139_p2), %v582_v57, %v581_v56  ;;  %v2157_v59 = vld [vmem:[%s2751_s1 + $0x10] ss:$0 sm:$0xff] (!%p139_p2) }
   0xd   : > { %s2755_s18 = smov (!%p163_p3, %s1547_s18), 63 }
   0xe   : > { %s1548_s27 = sshll.u32 %s2755_s18, 3  ;;  %1846 = vmatpush3.bf16.msra.mxu1 %v1809_v8 }
   0xf   : > { %s2052_s30 = scalar_lea.vmem %s2750_s0, %s1548_s27  ;;  %1839 = vmatprep.subr.bf16.mxu1 %v1813_v14  ;;  %s2366_s10 = scalar_lea.vmem %s2753_s3, %s1548_s27 }
  0x10   : > { %v174_v11 = vld [vmem:[%s2052_s30] sm:$0xff]  ;;  %v175_v12 = vld [vmem:[%s2052_s30 + $0x8] sm:$0xff]  ;;  %v176_v13 = vld [vmem:[%s2052_s30 + $0x10] sm:$0xff] }
  0x11   : > { %1673 = vmatprep.mubr.msk.f32.mxu0 %vm213_vm0, %v174_v11  ;;  %v177_v15 = vld [vmem:[%s2052_s30 + $0x18] sm:$0xff]  ;;  %v178_v18 = vld [vmem:[%s2052_s30 + $0x20] sm:$0xff]  ;;  %v179_v20 = vld [vmem:[%s2052_s30 + $0x28] sm:$0xff] }
  0x12   : > { %1674 = vmatmul.mubr.msk.f32.vlgmr.msra.gmra.mrb[0].mxu0 %vm213_vm0, %v175_v12  ;;  %1847 = vmatpush3.bf16.msra.mxu1 %v1813_v14  ;;  %v180_v23 = vld [vmem:[%s2052_s30 + $0x30] sm:$0xff]  ;;  %v181_v25 = vld [vmem:[%s2052_s30 + $0x38] sm:$0xff]  ;;  %v182_v28 = vld [vmem:[%s2052_s30 + $0x40] sm:$0xff] }
  0x13   : > { %1676 = vmatprep.mubr.msk.f32.mxu0 %vm213_vm0, %v176_v13  ;;  %1808 = vmatpush3.bf16.msra.mxu0 %v1805_v7  ;;  %v183_v30 = vld [vmem:[%s2052_s30 + $0x48] sm:$0xff]  ;;  %v184_v33 = vld [vmem:[%s2052_s30 + $0x50] sm:$0xff]  ;;  %v185_v35 = vld [vmem:[%s2052_s30 + $0x58] sm:$0xff] }
  0x14   : > { %1810 = vmatprep.subr.bf16.mxu0 %v1809_v8  ;;  %1840 = vmatprep.subr.bf16.mxu1 %v1817_v19  ;;  %v186_v36 = vld [vmem:[%s2052_s30 + $0x60] sm:$0xff]  ;;  %v187_v37 = vld [vmem:[%s2052_s30 + $0x68] sm:$0xff]  ;;  %v188_v38 = vld [vmem:[%s2052_s30 + $0x70] sm:$0xff] }
  0x15   : > { %v189_v39 = vld [vmem:[%s2052_s30 + $0x78] sm:$0xff]  ;;  %v190_v40 = vld [vmem:[%s2052_s30 + $0x80] sm:$0xff]  ;;  %v191_v41 = vld [vmem:[%s2052_s30 + $0x88] sm:$0xff] }
  0x16   : > { %1677 = vmatmul.mubr.msk.f32.gmra.mrb[2].mxu0 %vm213_vm0, %v177_v15  ;;  %1848 = vmatpush3.bf16.msra.mxu1 %v1817_v19  ;;  %v192_v42 = vld [vmem:[%s2052_s30 + $0x90] sm:$0xff]  ;;  %v193_v43 = vld [vmem:[%s2052_s30 + $0x98] sm:$0xff]  ;;  %v194_v44 = vld [vmem:[%s2052_s30 + $0xa0] sm:$0xff] }
  0x17   : > { %1679 = vmatprep.mubr.msk.f32.mxu0 %vm213_vm0, %v178_v18  ;;  %1812 = vmatpush3.bf16.msra.mxu0 %v1809_v8  ;;  %v195_v45 = vld [vmem:[%s2052_s30 + $0xa8] sm:$0xff]  ;;  %v196_v46 = vld [vmem:[%s2052_s30 + $0xb0] sm:$0xff]  ;;  %v197_v47 = vld [vmem:[%s2052_s30 + $0xb8] sm:$0xff] }
  0x18   : > { %1814 = vmatprep.subr.bf16.mxu0 %v1813_v14  ;;  %1841 = vmatprep.subr.bf16.mxu1 %v1821_v24  ;;  %v198_v48 = vld [vmem:[%s2052_s30 + $0xc0] sm:$0xff]  ;;  %v199_v49 = vld [vmem:[%s2052_s30 + $0xc8] sm:$0xff]  ;;  %v200_v50 = vld [vmem:[%s2052_s30 + $0xd0] sm:$0xff] }
  0x19   : > { %v201_v51 = vld [vmem:[%s2052_s30 + $0xd8] sm:$0xff]  ;;  %v202_v52 = vld [vmem:[%s2052_s30 + $0xe0] sm:$0xff]  ;;  %v203_v53 = vld [vmem:[%s2052_s30 + $0xe8] sm:$0xff] }
  0x1a   : > { %1680 = vmatmul.mubr.msk.f32.gmra.mrb[4].mxu0 %vm213_vm0, %v179_v20  ;;  %1849 = vmatpush3.bf16.msra.mxu1 %v1821_v24  ;;  %v204_v54 = vld [vmem:[%s2052_s30 + $0xf0] sm:$0xff]  ;;  %v205_v55 = vld [vmem:[%s2052_s30 + $0xf8] sm:$0xff] }
  0x1b   : > { %1682 = vmatprep.mubr.msk.f32.mxu0 %vm213_vm0, %v180_v23  ;;  %1816 = vmatpush3.bf16.msra.mxu0 %v1813_v14 }
  0x1c   : > { %1818 = vmatprep.subr.bf16.mxu0 %v1817_v19  ;;  %1842 = vmatprep.subr.bf16.mxu1 %v1825_v29 }
  0x1e   : > { %1683 = vmatmul.mubr.msk.f32.gmra.mrb[6].mxu0 %vm213_vm0, %v181_v25  ;;  %1850 = vmatpush3.bf16.msra.mxu1 %v1825_v29 }
  0x1f   : > { %1685 = vmatprep.mubr.msk.f32.mxu0 %vm213_vm0, %v182_v28  ;;  %1820 = vmatpush3.bf16.msra.mxu0 %v1817_v19 }
  0x20   : > { %1822 = vmatprep.subr.bf16.mxu0 %v1821_v24  ;;  %1843 = vmatprep.subr.bf16.mxu1 %v1829_v34 }
  0x22   : > { %1686 = vmatmul.mubr.msk.f32.gmra.mrb[8].mxu0 %vm213_vm0, %v183_v30  ;;  %1851 = vmatpush3.bf16.msra.mxu1 %v1829_v34 }
  0x23   : > { %1688 = vmatprep.mubr.msk.f32.mxu0 %vm213_vm0, %v184_v33  ;;  %1824 = vmatpush3.bf16.msra.mxu0 %v1821_v24 }
  0x24   : > { %1826 = vmatprep.subr.bf16.mxu0 %v1825_v29  ;;  %1844 = vmatprep.subr.bf16.mxu1 %v1833_v58 }
  0x26   : > { %1689 = vmatmul.mubr.msk.f32.gmra.mrb[10].mxu0 %vm213_vm0, %v185_v35  ;;  %1852 = vmatpush3.bf16.msra.mxu1 %v1833_v58 }
  0x27   : > { %1691 = vmatprep.mubr.msk.f32.mxu0 %vm213_vm0, %v186_v36  ;;  %1828 = vmatpush3.bf16.msra.mxu0 %v1825_v29 }
  0x28   : > { %1830 = vmatprep.subr.bf16.mxu0 %v1829_v34 }
  0x2a   : > { %1692 = vmatmul.mubr.msk.f32.gmra.mrb[12].mxu0 %vm213_vm0, %v187_v37 }
  0x2b   : > { %1694 = vmatprep.mubr.msk.f32.mxu0 %vm213_vm0, %v188_v38  ;;  %1832 = vmatpush3.bf16.msra.mxu0 %v1829_v34 }
  0x2c   : > { %1834 = vmatprep.subr.bf16.mxu0 %v1833_v58 }
  0x2e   : > { %1695 = vmatmul.mubr.msk.f32.gmra.mrb[14].mxu0 %vm213_vm0, %v189_v39 }
  0x2f   : > { %1697 = vmatprep.mubr.msk.f32.mxu0 %vm213_vm0, %v190_v40  ;;  %1836 = vmatpush3.bf16.msra.mxu0 %v1833_v58 }
  0x32   : > { %1698 = vmatmul.mubr.msk.f32.gmra.mrb[16].mxu0 %vm213_vm0, %v191_v41 }
  0x33   : > { %1700 = vmatprep.mubr.msk.f32.mxu0 %vm213_vm0, %v192_v42 }
  0x36   : > { %1701 = vmatmul.mubr.msk.f32.gmra.mrb[18].mxu0 %vm213_vm0, %v193_v43 }
  0x37   : > { %1703 = vmatprep.mubr.msk.f32.mxu0 %vm213_vm0, %v194_v44 }
  0x3a   : > { %1704 = vmatmul.mubr.msk.f32.gmra.mrb[20].mxu0 %vm213_vm0, %v195_v45 }
  0x3b   : > { %1706 = vmatprep.mubr.msk.f32.mxu0 %vm213_vm0, %v196_v46 }
  0x3e   : > { %1707 = vmatmul.mubr.msk.f32.gmra.mrb[22].mxu0 %vm213_vm0, %v197_v47 }
  0x3f   : > { %1709 = vmatprep.mubr.msk.f32.mxu0 %vm213_vm0, %v198_v48 }
  0x42   : > { %1710 = vmatmul.mubr.msk.f32.gmra.mrb[24].mxu0 %vm213_vm0, %v199_v49 }
  0x43   : > { %1712 = vmatprep.mubr.msk.f32.mxu0 %vm213_vm0, %v200_v50 }
  0x46   : > { %1713 = vmatmul.mubr.msk.f32.gmra.mrb[26].mxu0 %vm213_vm0, %v201_v51 }
  0x47   : > { %1715 = vmatprep.mubr.msk.f32.mxu0 %vm213_vm0, %v202_v52 }
  0x4a   : > { %1716 = vmatmul.mubr.msk.f32.gmra.mrb[28].mxu0 %vm213_vm0, %v203_v53 }
  0x4b   : > { %1718 = vmatprep.mubr.msk.f32.mxu0 %vm213_vm0, %v204_v54 }
  0x4e   : > { %1719 = vmatmul.mubr.msk.f32.gmra.mrb[30].mxu0 %vm213_vm0, %v205_v55 }
  0xe5   : > { %v1675_v60 = vpop.f32.mrb[0].mxu0 }
  0xe6   : > { %v382_v61 = vadd.f32 %v1675_v60, %v2157_v59  ;;  %v376_v62 = vpop.f32.mrb[1].mxu0 }
  0xe7   : > { %v377_v63 = vadd.f32 %v2157_v59, %v376_v62 }
  0xe8   : > { %v536_v2 = vmax.f32 %v382_v61, 0.0 }
  0xe9   : > { %v535_v0 = vmax.f32 %v377_v63, 0.0  ;;  %v1678_v1 = vpop.f32.mrb[2].mxu0 }
  0xea   : > { %v392_v3 = vadd.f32 %v1678_v1, %v2157_v59  ;;  %v386_v4 = vpop.f32.mrb[3].mxu0 }
  0xeb   : > { %v387_v5 = vadd.f32 %v2157_v59, %v386_v4  ;;  %1753 = vmatprep.mubr.f32.mxu0 %v535_v0 }
  0xec   : > { %1754 = vmatmul.mubr.f32.vlgmr.msra.gmra.mrb[32].mxu0 %v536_v2  ;;  %v538_v8 = vmax.f32 %v392_v3, 0.0 }
  0xed   : > { %v537_v6 = vmax.f32 %v387_v5, 0.0  ;;  %v1681_v7 = vpop.f32.mrb[4].mxu0 }
  0xee   : > { %v402_v9 = vadd.f32 %v1681_v7, %v2157_v59  ;;  %v396_v10 = vpop.f32.mrb[5].mxu0 }
  0xef   : > { %v397_v11 = vadd.f32 %v2157_v59, %v396_v10  ;;  %1756 = vmatprep.mubr.f32.mxu0 %v537_v6 }
  0xf0   : > { %1757 = vmatmul.mubr.f32.gmra.mrb[34].mxu0 %v538_v8  ;;  %v540_v14 = vmax.f32 %v402_v9, 0.0 }
  0xf1   : > { %v539_v12 = vmax.f32 %v397_v11, 0.0  ;;  %v1684_v13 = vpop.f32.mrb[6].mxu0 }
  0xf2   : > { %v412_v15 = vadd.f32 %v1684_v13, %v2157_v59  ;;  %v406_v16 = vpop.f32.mrb[7].mxu0 }
  0xf3   : > { %1759 = vmatprep.mubr.f32.mxu0 %v539_v12  ;;  %v407_v17 = vadd.f32 %v2157_v59, %v406_v16 }
  0xf4   : > { %1760 = vmatmul.mubr.f32.gmra.mrb[36].mxu0 %v540_v14  ;;  %v542_v20 = vmax.f32 %v412_v15, 0.0 }
  0xf5   : > { %v1687_v18 = vpop.f32.mrb[8].mxu0  ;;  %v541_v19 = vmax.f32 %v407_v17, 0.0 }
  0xf6   : > { %v422_v21 = vadd.f32 %v1687_v18, %v2157_v59  ;;  %v416_v22 = vpop.f32.mrb[9].mxu0 }
  0xf7   : > { %v417_v23 = vadd.f32 %v2157_v59, %v416_v22  ;;  %1762 = vmatprep.mubr.f32.mxu1 %v541_v19 }
  0xf8   : > { %1763 = vmatmul.mubr.f32.vlgmr.msra.gmra.mrb[0].mxu1 %v542_v20  ;;  %v544_v26 = vmax.f32 %v422_v21, 0.0 }
  0xf9   : > { %v543_v24 = vmax.f32 %v417_v23, 0.0  ;;  %v1690_v25 = vpop.f32.mrb[10].mxu0 }
  0xfa   : > { %v432_v27 = vadd.f32 %v1690_v25, %v2157_v59  ;;  %v426_v28 = vpop.f32.mrb[11].mxu0 }
  0xfb   : > { %v427_v29 = vadd.f32 %v2157_v59, %v426_v28  ;;  %1765 = vmatprep.mubr.f32.mxu1 %v543_v24 }
  0xfc   : > { %1766 = vmatmul.mubr.f32.gmra.mrb[2].mxu1 %v544_v26  ;;  %v546_v32 = vmax.f32 %v432_v27, 0.0 }
  0xfd   : > { %v545_v30 = vmax.f32 %v427_v29, 0.0  ;;  %v1693_v31 = vpop.f32.mrb[12].mxu0  ;;  %v2194_v29 = vld [vmem:[%s2752_s2 + $0x80] ss:$0 sm:$0xff] }
  0xfe   : > { %v442_v33 = vadd.f32 %v1693_v31, %v2157_v59  ;;  %v436_v34 = vpop.f32.mrb[13].mxu0 }
  0xff   : > { %v437_v35 = vadd.f32 %v2157_v59, %v436_v34  ;;  %1768 = vmatprep.mubr.f32.mxu1 %v545_v30 }
 0x100   : > { %1769 = vmatmul.mubr.f32.gmra.mrb[4].mxu1 %v546_v32  ;;  %v548_v38 = vmax.f32 %v442_v33, 0.0 }
 0x101   : > { %v547_v36 = vmax.f32 %v437_v35, 0.0  ;;  %v1696_v37 = vpop.f32.mrb[14].mxu0 }
 0x102   : > { %v452_v39 = vadd.f32 %v1696_v37, %v2157_v59  ;;  %v446_v40 = vpop.f32.mrb[15].mxu0 }
 0x103   : > { %v447_v41 = vadd.f32 %v2157_v59, %v446_v40  ;;  %1771 = vmatprep.mubr.f32.mxu1 %v547_v36 }
 0x104   : > { %1772 = vmatmul.mubr.f32.gmra.mrb[6].mxu1 %v548_v38  ;;  %v550_v44 = vmax.f32 %v452_v39, 0.0 }
 0x105   : > { %v549_v42 = vmax.f32 %v447_v41, 0.0  ;;  %v1699_v43 = vpop.f32.mrb[16].mxu0 }
 0x106   : > { %v462_v45 = vadd.f32 %v1699_v43, %v2157_v59  ;;  %v456_v46 = vpop.f32.mrb[17].mxu0 }
 0x107   : > { %v457_v47 = vadd.f32 %v2157_v59, %v456_v46  ;;  %1774 = vmatprep.mubr.f32.mxu1 %v549_v42 }
 0x108   : > { %1775 = vmatmul.mubr.f32.gmra.mrb[8].mxu1 %v550_v44  ;;  %v552_v50 = vmax.f32 %v462_v45, 0.0 }
 0x109   : > { %v551_v48 = vmax.f32 %v457_v47, 0.0  ;;  %v1702_v49 = vpop.f32.mrb[18].mxu0 }
 0x10a   : > { %v472_v51 = vadd.f32 %v1702_v49, %v2157_v59  ;;  %v466_v52 = vpop.f32.mrb[19].mxu0 }
 0x10b   : > { %v467_v53 = vadd.f32 %v2157_v59, %v466_v52  ;;  %1777 = vmatprep.mubr.f32.mxu1 %v551_v48 }
 0x10c   : > { %1778 = vmatmul.mubr.f32.gmra.mrb[10].mxu1 %v552_v50  ;;  %v554_v56 = vmax.f32 %v472_v51, 0.0 }
 0x10d   : > { %v553_v54 = vmax.f32 %v467_v53, 0.0  ;;  %v1705_v55 = vpop.f32.mrb[20].mxu0 }
 0x10e   : > { %v482_v57 = vadd.f32 %v1705_v55, %v2157_v59  ;;  %v476_v58 = vpop.f32.mrb[21].mxu0 }
 0x10f   : > { %v477_v60 = vadd.f32 %v2157_v59, %v476_v58  ;;  %1780 = vmatprep.mubr.f32.mxu1 %v553_v54 }
 0x110   : > { %1781 = vmatmul.mubr.f32.gmra.mrb[12].mxu1 %v554_v56  ;;  %v556_v63 = vmax.f32 %v482_v57, 0.0 }
 0x111   : > { %v555_v61 = vmax.f32 %v477_v60, 0.0  ;;  %v1708_v62 = vpop.f32.mrb[22].mxu0 }
 0x112   : > { %v492_v0 = vadd.f32 %v1708_v62, %v2157_v59  ;;  %v486_v1 = vpop.f32.mrb[23].mxu0 }
 0x113   : > { %v487_v2 = vadd.f32 %v2157_v59, %v486_v1  ;;  %1783 = vmatprep.mubr.f32.mxu1 %v555_v61 }
 0x114   : > { %1784 = vmatmul.mubr.f32.gmra.mrb[14].mxu1 %v556_v63  ;;  %v558_v5 = vmax.f32 %v492_v0, 0.0 }
 0x115   : > { %v557_v3 = vmax.f32 %v487_v2, 0.0  ;;  %v1711_v4 = vpop.f32.mrb[24].mxu0 }
 0x116   : > { %v502_v6 = vadd.f32 %v1711_v4, %v2157_v59  ;;  %v496_v7 = vpop.f32.mrb[25].mxu0 }
 0x117   : > { %v497_v8 = vadd.f32 %v2157_v59, %v496_v7  ;;  %1786 = vmatprep.mubr.f32.mxu1 %v557_v3 }
 0x118   : > { %1787 = vmatmul.mubr.f32.gmra.mrb[16].mxu1 %v558_v5  ;;  %v560_v11 = vmax.f32 %v502_v6, 0.0 }
 0x119   : > { %v559_v9 = vmax.f32 %v497_v8, 0.0  ;;  %v1714_v10 = vpop.f32.mrb[26].mxu0 }
 0x11a   : > { %v512_v12 = vadd.f32 %v1714_v10, %v2157_v59  ;;  %v506_v13 = vpop.f32.mrb[27].mxu0 }
 0x11b   : > { %v507_v14 = vadd.f32 %v2157_v59, %v506_v13  ;;  %1789 = vmatprep.mubr.f32.mxu1 %v559_v9 }
 0x11c   : > { %1790 = vmatmul.mubr.f32.gmra.mrb[18].mxu1 %v560_v11  ;;  %v562_v17 = vmax.f32 %v512_v12, 0.0 }
 0x11d   : > { %v561_v15 = vmax.f32 %v507_v14, 0.0  ;;  %v1717_v16 = vpop.f32.mrb[28].mxu0 }
 0x11e   : > { %v522_v18 = vadd.f32 %v1717_v16, %v2157_v59  ;;  %v516_v19 = vpop.f32.mrb[29].mxu0 }
 0x11f   : > { %v517_v20 = vadd.f32 %v2157_v59, %v516_v19  ;;  %1792 = vmatprep.mubr.f32.mxu1 %v561_v15 }
 0x120   : > { %1793 = vmatmul.mubr.f32.gmra.mrb[20].mxu1 %v562_v17  ;;  %v564_v23 = vmax.f32 %v522_v18, 0.0 }
 0x121   : > { %v563_v21 = vmax.f32 %v517_v20, 0.0  ;;  %v1720_v22 = vpop.f32.mrb[30].mxu0 }
 0x122   : > { %v532_v24 = vadd.f32 %v1720_v22, %v2157_v59  ;;  %v526_v25 = vpop.f32.mrb[31].mxu0 }
 0x123   : > { %v527_v26 = vadd.f32 %v2157_v59, %v526_v25  ;;  %1795 = vmatprep.mubr.f32.mxu1 %v563_v21 }
 0x124   : > { %1796 = vmatmul.mubr.f32.gmra.mrb[22].mxu1 %v564_v23  ;;  %v566_v28 = vmax.f32 %v532_v24, 0.0 }
 0x125   : > { %v565_v27 = vmax.f32 %v527_v26, 0.0 }
 0x127   : > { %1798 = vmatprep.mubr.f32.mxu1 %v565_v27 }
 0x128   : > { %1799 = vmatmul.mubr.f32.gmra.mrb[24].mxu1 %v566_v28 }
 0x1bf   : > { %v1755_v30 = vpop.f32.mrb[32].mxu0 }
 0x1c0   : > { %v660_v31 = vadd.f32 %v1755_v30, %v2194_v29  ;;  %v654_v32 = vpop.f32.mrb[33].mxu0 }
 0x1c1   : > { %v655_v33 = vadd.f32 %v2194_v29, %v654_v32 }
 0x1c2   : > { %v814_v34 = vmax.f32 %v660_v31, 0.0 }
 0x1c3   : > { %v813_v59 = vmax.f32 %v655_v33, 0.0  ;;  %v1758_v35 = vpop.f32.mrb[34].mxu0 }
 0x1c4   : > { %v853_v36 = vsel %vm845_vm1, %v814_v34, -inf  ;;  %v2200_v37 = vadd.f32 %v1758_v35, %v2194_v29  ;;  %v664_v38 = vpop.f32.mrb[35].mxu0 }
 0x1c5   : > { %v854_v39 = vrot.slane %v853_v36, 4  ;;  %v846_v40 = vsel %vm845_vm1, %v813_v59, -inf  ;;  %v2204_v41 = vadd.f32 %v2194_v29, %v664_v38 }
 0x1c6   : > { %v847_v42 = vrot.slane %v846_v40, 4  ;;  %v816_v43 = vmax.f32 %v2200_v37, 0.0 }
 0x1c7   : > { %v855_v44 = vmax.f32 %v853_v36, %v854_v39  ;;  %v815_v45 = vmax.f32 %v2204_v41, 0.0  ;;  %v1761_v46 = vpop.f32.mrb[36].mxu0 }
 0x1c8   : > { %v848_v47 = vmax.f32 %v846_v40, %v847_v42  ;;  %v867_v48 = vsel %vm845_vm1, %v816_v43, -inf  ;;  %v2210_v49 = vadd.f32 %v1761_v46, %v2194_v29  ;;  %v674_v50 = vpop.f32.mrb[37].mxu0 }
 0x1c9   : > { %v856_v51 = vrot.slane %v855_v44, 2  ;;  %v868_v52 = vrot.slane %v867_v48, 4  ;;  %v860_v53 = vsel %vm845_vm1, %v815_v45, -inf  ;;  %v2216_v54 = vadd.f32 %v2194_v29, %v674_v50 }
 0x1ca   : > { %v849_v55 = vrot.slane %v848_v47, 2  ;;  %v861_v56 = vrot.slane %v860_v53, 4  ;;  %v818_v57 = vmax.f32 %v2210_v49, 0.0 }
 0x1cb   : > { %v857_v58 = vmax.f32 %v855_v44, %v856_v51  ;;  %v869_v60 = vmax.f32 %v867_v48, %v868_v52  ;;  %v817_v61 = vmax.f32 %v2216_v54, 0.0  ;;  %v1764_v62 = vpop.f32.mrb[0].mxu1 }
 0x1cc   : > { %v850_v63 = vmax.f32 %v848_v47, %v849_v55  ;;  %v862_v0 = vmax.f32 %v860_v53, %v861_v56  ;;  %v881_v1 = vsel %vm845_vm1, %v818_v57, -inf  ;;  %v2224_v2 = vadd.f32 %v1764_v62, %v2194_v29  ;;  %v684_v3 = vpop.f32.mrb[1].mxu1 }
 0x1cd   : > { %v858_v4 = vrot.slane %v857_v58, 1  ;;  %v870_v5 = vrot.slane %v869_v60, 2  ;;  %v882_v6 = vrot.slane %v881_v1, 4  ;;  %v874_v7 = vsel %vm845_vm1, %v817_v61, -inf }
 0x1ce   : > { %v851_v8 = vrot.slane %v850_v63, 1  ;;  %v863_v9 = vrot.slane %v862_v0, 2  ;;  %v875_v10 = vrot.slane %v874_v7, 4  ;;  %v820_v11 = vmax.f32 %v2224_v2, 0.0 }
 0x1cf   : > { %v859_v12 = vmax.f32 %v857_v58, %v858_v4  ;;  %v871_v13 = vmax.f32 %v869_v60, %v870_v5  ;;  %v883_v14 = vmax.f32 %v881_v1, %v882_v6  ;;  %v2231_v15 = vadd.f32 %v2194_v29, %v684_v3  ;;  %v1767_v16 = vpop.f32.mrb[2].mxu1 }
 0x1d0   : > { %v852_v17 = vmax.f32 %v850_v63, %v851_v8  ;;  %v864_v18 = vmax.f32 %v862_v0, %v863_v9  ;;  %v876_v19 = vmax.f32 %v874_v7, %v875_v10  ;;  %v895_v20 = vsel %vm845_vm1, %v820_v11, -inf  ;;  %v694_v21 = vpop.f32.mrb[3].mxu1 }
 0x1d1   : > { %v1071_v22 = vsub.f32 %v814_v34, %v859_v12  ;;  %v872_v23 = vrot.slane %v871_v13, 1  ;;  %v884_v24 = vrot.slane %v883_v14, 2  ;;  %v896_v25 = vrot.slane %v895_v20, 4 }
 0x1d2   : > { %v1070_v26 = vsub.f32 %v813_v59, %v852_v17  ;;  %v865_v27 = vrot.slane %v864_v18, 1  ;;  %v877_v28 = vrot.slane %v876_v19, 2  ;;  %v819_v30 = vmax.f32 %v2231_v15, 0.0 }
 0x1d3   : > { %v1104_v31 = vmul.f32 1.442695, %v1071_v22  ;;  %v873_v32 = vmax.f32 %v871_v13, %v872_v23  ;;  %v885_v33 = vmax.f32 %v883_v14, %v884_v24  ;;  %v897_v35 = vmax.f32 %v895_v20, %v896_v25  ;;  %v1770_v36 = vpop.f32.mrb[4].mxu1 }
 0x1d4   : > { %v1102_v37 = vmul.f32 1.442695, %v1070_v26  ;;  %v866_v38 = vmax.f32 %v864_v18, %v865_v27  ;;  %v878_v39 = vmax.f32 %v876_v19, %v877_v28  ;;  %v888_v34 = vsel %vm845_vm1, %v819_v30, -inf  ;;  %v704_v40 = vpop.f32.mrb[5].mxu1 }
 0x1d5   : > { %1861 = vpow2.f32 %v1104_v31  ;;  %v1073_v42 = vsub.f32 %v816_v43, %v873_v32  ;;  %v886_v59 = vrot.slane %v885_v33, 1  ;;  %v898_v44 = vrot.slane %v897_v35, 2 }
 0x1d6   : > { %1863 = vpow2.f32 %v1102_v37  ;;  %v1072_v46 = vsub.f32 %v815_v45, %v866_v38  ;;  %v879_v47 = vrot.slane %v878_v39, 1  ;;  %v889_v48 = vrot.slane %v888_v34, 4 }
 0x1d7   : > { %v1108_v50 = vmul.f32 1.442695, %v1073_v42  ;;  %v887_v51 = vmax.f32 %v885_v33, %v886_v59  ;;  %v899_v52 = vmax.f32 %v897_v35, %v898_v44  ;;  %v2243_v53 = vadd.f32 %v1767_v16, %v2194_v29  ;;  %v1773_v55 = vpop.f32.mrb[6].mxu1 }
 0x1d8   : > { %v1106_v56 = vmul.f32 1.442695, %v1072_v46  ;;  %v880_v58 = vmax.f32 %v878_v39, %v879_v47  ;;  %v890_v60 = vmax.f32 %v888_v34, %v889_v48  ;;  %v2246_v43 = vadd.f32 %v2194_v29, %v694_v21  ;;  %v2248_v62 = vpop.f32.mrb[7].mxu1 }
 0x1d9   : > { %1865 = vpow2.f32 %v1108_v50  ;;  %v1075_v41 = vsub.f32 %v818_v57, %v887_v51  ;;  %v900_v45 = vrot.slane %v899_v52, 1  ;;  %v822_v63 = vmax.f32 %v2243_v53, 0.0 }
 0x1da   : > { %1867 = vpow2.f32 %v1106_v56  ;;  %v1074_v0 = vsub.f32 %v817_v61, %v880_v58  ;;  %v891_v1 = vrot.slane %v890_v60, 2  ;;  %v821_v3 = vmax.f32 %v2246_v43, 0.0 }
 0x1db   : > { %v1112_v4 = vmul.f32 1.442695, %v1075_v41  ;;  %v901_v5 = vmax.f32 %v899_v52, %v900_v45  ;;  %v909_v6 = vsel %vm845_vm1, %v822_v63, -inf  ;;  %v2260_v7 = vadd.f32 %v1770_v36, %v2194_v29  ;;  %v2262_v49 = vpop.f32.mrb[8].mxu1 }
 0x1dc   : > { %v1110_v57 = vmul.f32 1.442695, %v1074_v0  ;;  %v892_v8 = vmax.f32 %v890_v60, %v891_v1  ;;  %v910_v9 = vrot.slane %v909_v6, 4  ;;  %v902_v54 = vsel %vm845_vm1, %v821_v3, -inf  ;;  %v2267_v61 = vpop.f32.mrb[9].mxu1 }
 0x1dd   : > { %1869 = vpow2.f32 %v1112_v4  ;;  %v1077_v10 = vsub.f32 %v820_v11, %v901_v5  ;;  %v903_v12 = vrot.slane %v902_v54, 4  ;;  %v824_v13 = vmax.f32 %v2260_v7, 0.0 }
 0x1de   : > { %1871 = vpow2.f32 %v1110_v57  ;;  %v893_v14 = vrot.slane %v892_v8, 1  ;;  %v911_v16 = vmax.f32 %v909_v6, %v910_v9  ;;  %v2273_v17 = vadd.f32 %v2194_v29, %v704_v40 }
 0x1df   : > { %v2275_v18 = vpop.eup %1861  ;;  %v1116_v19 = vmul.f32 1.442695, %v1077_v10  ;;  %v904_v20 = vmax.f32 %v902_v54, %v903_v12  ;;  %v923_v21 = vsel %vm845_vm1, %v824_v13, -inf  ;;  %v2281_v2 = vadd.f32 %v1773_v55, %v2194_v29  ;;  %v2283_v11 = vpop.f32.mrb[10].mxu1 }
 0x1e0   : > { %v2285_v22 = vpop.eup %1863  ;;  %v1173_v23 = vsel %vm845_vm1, %v2275_v18, 0.0  ;;  %v894_v24 = vmax.f32 %v892_v8, %v893_v14  ;;  %v912_v25 = vrot.slane %v911_v16, 2  ;;  %v924_v26 = vrot.slane %v923_v21, 4  ;;  %v2289_v27 = vpop.f32.mrb[11].mxu1 }
 0x1e1   : > { %v1174_v28 = vrot.slane %v1173_v23, 4  ;;  %v1166_v31 = vsel %vm845_vm1, %v2285_v22, 0.0  ;;  %1873 = vpow2.f32 %v1116_v19  ;;  %v905_v32 = vrot.slane %v904_v20, 2 }
 0x1e2   : > { %v1167_v33 = vrot.slane %v1166_v31, 4  ;;  %v1076_v35 = vsub.f32 %v819_v30, %v894_v24  ;;  %v913_v36 = vmax.f32 %v911_v16, %v912_v25  ;;  %v2295_v37 = vmax.f32 %v923_v21, %v924_v26 }
 0x1e3   : > { %v2297_v38 = vpop.eup %1865  ;;  %v1175_v39 = vadd.f32 %v1174_v28, %v1173_v23  ;;  %v906_v34 = vmax.f32 %v904_v20, %v905_v32  ;;  %v823_v40 = vmax.f32 %v2273_v17, 0.0  ;;  %v826_v42 = vmax.f32 %v2281_v2, 0.0  ;;  %v2301_v59 = vpop.f32.mrb[12].mxu1 }
 0x1e4   : > { %v2303_v44 = vpop.eup %1867  ;;  %v1168_v46 = vadd.f32 %v1167_v33, %v1166_v31  ;;  %v1187_v15 = vsel %vm845_vm1, %v2297_v38, 0.0  ;;  %v1114_v30 = vmul.f32 1.442695, %v1076_v35  ;;  %v914_v47 = vrot.slane %v913_v36, 1  ;;  %v2307_v48 = vpop.f32.mrb[13].mxu1 }
 0x1e5   : > { %v1176_v50 = vrot.slane %v1175_v39, 2  ;;  %v1188_v51 = vrot.slane %v1187_v15, 4  ;;  %v1180_v52 = vsel %vm845_vm1, %v2303_v44, 0.0  ;;  %v907_v55 = vrot.slane %v906_v34, 1 }
 0x1e6   : > { %v1169_v56 = vrot.slane %v1168_v46, 2  ;;  %v1181_v58 = vrot.slane %v1180_v52, 4  ;;  %1875 = vpow2.f32 %v1114_v30  ;;  %v915_v60 = vmax.f32 %v913_v36, %v914_v47 }
 0x1e7   : > { %v2311_v41 = vpop.eup %1869  ;;  %v1177_v45 = vadd.f32 %v1176_v50, %v1175_v39  ;;  %v1189_v0 = vadd.f32 %v1188_v51, %v1187_v15  ;;  %v908_v1 = vmax.f32 %v906_v34, %v907_v55  ;;  %v926_v4 = vrot.slane %v2295_v37, 2  ;;  %v2314_v5 = vpop.f32.mrb[14].mxu1 }
 0x1e8   : > { %v2316_v6 = vpop.eup %1871  ;;  %v1170_v57 = vadd.f32 %v1169_v56, %v1168_v46  ;;  %v1182_v8 = vadd.f32 %v1181_v58, %v1180_v52  ;;  %v1201_v9 = vsel %vm845_vm1, %v2311_v41, 0.0  ;;  %v1079_v54 = vsub.f32 %v822_v63, %v915_v60  ;;  %v2322_v10 = vpop.f32.mrb[15].mxu1 }
 0x1e9   : > { %v1178_v12 = vrot.slane %v1177_v45, 1  ;;  %v1190_v14 = vrot.slane %v1189_v0, 2  ;;  %v1202_v16 = vrot.slane %v1201_v9, 4  ;;  %v1194_v19 = vsel %vm845_vm1, %v2316_v6, 0.0 }
 0x1ea   : > { %v1171_v20 = vrot.slane %v1170_v57, 1  ;;  %v1183_v21 = vrot.slane %v1182_v8, 2  ;;  %v1195_v23 = vrot.slane %v1194_v19, 4  ;;  %v1120_v24 = vmul.f32 1.442695, %v1079_v54 }
 0x1eb   : > { %v2326_v25 = vpop.eup %1873  ;;  %v1179_v26 = vadd.f32 %v1178_v12, %v1177_v45  ;;  %v1191_v28 = vadd.f32 %v1190_v14, %v1189_v0  ;;  %v1203_v31 = vadd.f32 %v1202_v16, %v1201_v9  ;;  %v1078_v53 = vsub.f32 %v821_v3, %v908_v1  ;;  %v2330_v63 = vpop.f32.mrb[16].mxu1 }
 0x1ec   : > { %v1172_v32 = vadd.f32 %v1171_v20, %v1170_v57  ;;  %v1184_v33 = vadd.f32 %v1183_v21, %v1182_v8  ;;  %v1196_v35 = vadd.f32 %v1195_v23, %v1194_v19  ;;  %v1215_v36 = vsel %vm845_vm1, %v2326_v25, 0.0  ;;  %v2334_v39 = vpop.f32.mrb[17].mxu1 }
 0x1ed   : > { %1877 = vrcp.f32 %v1179_v26  ;;  %v1192_v34 = vrot.slane %v1191_v28, 1  ;;  %v1204_v46 = vrot.slane %v1203_v31, 2  ;;  %v1216_v15 = vrot.slane %v1215_v36, 4 }
 0x1ee   : > { %1879 = vrcp.f32 %v1172_v32  ;;  %v1185_v30 = vrot.slane %v1184_v33, 1  ;;  %v1197_v47 = vrot.slane %v1196_v35, 2  ;;  %v1118_v50 = vmul.f32 1.442695, %v1078_v53 }
 0x1ef   : > { %v1193_v43 = vadd.f32 %v1192_v34, %v1191_v28  ;;  %v1205_v3 = vadd.f32 %v1204_v46, %v1203_v31  ;;  %v1217_v51 = vadd.f32 %v1216_v15, %v1215_v36  ;;  %1881 = vpow2.f32 %v1120_v24  ;;  %v2336_v52 = vpop.f32.mrb[18].mxu1 }
 0x1f0   : > { %v2338_v55 = vpop.eup %1875  ;;  %v1186_v56 = vadd.f32 %v1185_v30, %v1184_v33  ;;  %v1198_v58 = vadd.f32 %v1197_v47, %v1196_v35  ;;  %1883 = vpow2.f32 %v1118_v50  ;;  %v927_v60 = vmax.f32 %v2295_v37, %v926_v4  ;;  %v2341_v45 = vpop.f32.mrb[19].mxu1 }
 0x1f1   : > { %1885 = vrcp.f32 %v1193_v43  ;;  %v1206_v0 = vrot.slane %v1205_v3, 1  ;;  %v1218_v1 = vrot.slane %v1217_v51, 2  ;;  %v1208_v57 = vsel %vm845_vm1, %v2338_v55, 0.0 }
 0x1f2   : > { %1887 = vrcp.f32 %v1186_v56  ;;  %v1199_v8 = vrot.slane %v1198_v58, 1  ;;  %v1209_v9 = vrot.slane %v1208_v57, 4  ;;  %v928_v54 = vrot.slane %v927_v60, 1 }
 0x1f3   : > { %v1207_v12 = vadd.f32 %v1206_v0, %v1205_v3  ;;  %v1219_v14 = vadd.f32 %v1218_v1, %v1217_v51  ;;  %v916_v16 = vsel %vm845_vm1, %v823_v40, -inf  ;;  %v937_v37 = vsel %vm845_vm1, %v826_v42, -inf  ;;  %v2351_v4 = vpop.f32.mrb[20].mxu1 }
 0x1f4   : > { %v1200_v19 = vadd.f32 %v1199_v8, %v1198_v58  ;;  %v1210_v20 = vadd.f32 %v1209_v9, %v1208_v57  ;;  %v929_v21 = vmax.f32 %v927_v60, %v928_v54  ;;  %v917_v23 = vrot.slane %v916_v16, 4  ;;  %v2353_v24 = vpop.f32.mrb[21].mxu1 }
 0x1f5   : > { %1889 = vrcp.f32 %v1207_v12  ;;  %v1220_v26 = vrot.slane %v1219_v14, 1  ;;  %v938_v28 = vrot.slane %v937_v37, 4  ;;  %v2357_v31 = vadd.f32 %v2194_v29, %v2248_v62 }
 0x1f6   : > { %1891 = vrcp.f32 %v1200_v19  ;;  %v1211_v53 = vrot.slane %v1210_v20, 2  ;;  %v1081_v32 = vsub.f32 %v824_v13, %v929_v21  ;;  %v918_v33 = vmax.f32 %v916_v16, %v917_v23 }
 0x1f7   : > { %v1878_v35 = vpop.eup %1877  ;;  %v1221_v36 = vadd.f32 %v1220_v26, %v1219_v14  ;;  %v939_v34 = vmax.f32 %v937_v37, %v938_v28  ;;  %v825_v46 = vmax.f32 %v2357_v31, 0.0  ;;  %v2371_v62 = vadd.f32 %v2262_v49, %v2194_v29  ;;  %v2373_v15 = vpop.f32.mrb[22].mxu1 }
 0x1f8   : > { %v1880_v7 = vpop.eup %1879  ;;  %v1393_v13 = vmul.f32 %v1878_v35, %v2275_v18  ;;  %v1212_v30 = vadd.f32 %v1211_v53, %v1210_v20  ;;  %v1124_v47 = vmul.f32 1.442695, %v1081_v32  ;;  %v919_v50 = vrot.slane %v918_v33, 2  ;;  %v2376_v43 = vpop.f32.mrb[23].mxu1 }
 0x1f9   : > { %v2378_v3 = vpop.eup %1881  ;;  %v1391_v51 = vmul.f32 %v1880_v7, %v2285_v22  ;;  %1893 = vrcp.f32 %v1221_v36  ;;  %v940_v56 = vrot.slane %v939_v34, 2  ;;  %v930_v49 = vsel %vm845_vm1, %v825_v46, -inf }
 0x1fa   : > { %v2384_v58 = vpop.eup %1883  ;;  %1455 = vst.msk [vmem:[%s2366_s10 + $0x8] sm:$0xff] %vm845_vm1, %v1393_v13  ;;  %v1213_v18 = vrot.slane %v1212_v30, 1  ;;  %v1229_v60 = vsel %vm845_vm1, %v2378_v3, 0.0  ;;  %1895 = vpow2.f32 %v1124_v47  ;;  %v920_v0 = vmax.f32 %v918_v33, %v919_v50 }
 0x1fb   : > { %v1886_v1 = vpop.eup %1885  ;;  %1454 = vst.msk [vmem:[%s2366_s10] sm:$0xff] %vm845_vm1, %v1391_v51  ;;  %v1230_v22 = vrot.slane %v1229_v60, 4  ;;  %v1222_v57 = vsel %vm845_vm1, %v2384_v58, 0.0  ;;  %v941_v8 = vmax.f32 %v939_v34, %v940_v56  ;;  %v931_v9 = vrot.slane %v930_v49, 4  ;;  %v2394_v54 = vpop.f32.mrb[24].mxu1 }
 0x1fc   : > { %v1888_v12 = vpop.eup %1887  ;;  %v1397_v14 = vmul.f32 %v1886_v1, %v2297_v38  ;;  %v1214_v16 = vadd.f32 %v1213_v18, %v1212_v30  ;;  %v1223_v37 = vrot.slane %v1222_v57, 4  ;;  %v921_v19 = vrot.slane %v920_v0, 1  ;;  %v2397_v20 = vpop.f32.mrb[25].mxu1 }
 0x1fd   : > { %v1395_v21 = vmul.f32 %v1888_v12, %v2303_v44  ;;  %v1231_v23 = vadd.f32 %v1230_v22, %v1229_v60  ;;  %v942_v26 = vrot.slane %v941_v8, 1  ;;  %v932_v28 = vmax.f32 %v930_v49, %v931_v9 }
 0x1fe   : > { %1457 = vst.msk [vmem:[%s2366_s10 + $0x18] sm:$0xff] %vm845_vm1, %v1397_v14  ;;  %1897 = vrcp.f32 %v1214_v16  ;;  %v1224_v53 = vadd.f32 %v1223_v37, %v1222_v57  ;;  %v922_v32 = vmax.f32 %v920_v0, %v921_v19  ;;  %v828_v33 = vmax.f32 %v2371_v62, 0.0 }
 0x1ff   : > { %v1890_v35 = vpop.eup %1889  ;;  %1456 = vst.msk [vmem:[%s2366_s10 + $0x10] sm:$0xff] %vm845_vm1, %v1395_v21  ;;  %v1232_v38 = vrot.slane %v1231_v23, 2  ;;  %v943_v36 = vmax.f32 %v941_v8, %v942_v26  ;;  %v933_v34 = vrot.slane %v932_v28, 2  ;;  %v2407_v44 = vadd.f32 %v2194_v29, %v2267_v61 }
 0x200   : > { %v1892_v7 = vpop.eup %1891  ;;  %v1401_v13 = vmul.f32 %v1890_v35, %v2311_v41  ;;  %v1225_v30 = vrot.slane %v1224_v53, 2  ;;  %v1080_v47 = vsub.f32 %v823_v40, %v922_v32  ;;  %v951_v50 = vsel %vm845_vm1, %v828_v33, -inf }
 0x201   : > { %v1399_v51 = vmul.f32 %v1892_v7, %v2316_v6  ;;  %v1233_v56 = vadd.f32 %v1232_v38, %v1231_v23  ;;  %v1083_v49 = vsub.f32 %v826_v42, %v943_v36  ;;  %v934_v61 = vmax.f32 %v932_v28, %v933_v34 }
 0x202   : > { %1459 = vst.msk [vmem:[%s2366_s10 + $0x28] sm:$0xff] %vm845_vm1, %v1401_v13  ;;  %v1226_v18 = vadd.f32 %v1225_v30, %v1224_v53  ;;  %v1122_v60 = vmul.f32 1.442695, %v1080_v47  ;;  %v952_v41 = vrot.slane %v951_v50, 4  ;;  %v827_v0 = vmax.f32 %v2407_v44, 0.0 }
 0x203   : > { %v1894_v17 = vpop.eup %1893  ;;  %1458 = vst.msk [vmem:[%s2366_s10 + $0x20] sm:$0xff] %vm845_vm1, %v1399_v51  ;;  %v1234_v40 = vrot.slane %v1233_v56, 1  ;;  %v1128_v1 = vmul.f32 1.442695, %v1083_v49  ;;  %v935_v22 = vrot.slane %v934_v61, 1  ;;  %v2425_v6 = vadd.f32 %v2283_v11, %v2194_v29 }
 0x204   : > { %v2427_v2 = vpop.eup %1895  ;;  %v1405_v42 = vmul.f32 %v1894_v17, %v2326_v25  ;;  %v1227_v57 = vrot.slane %v1226_v18, 1  ;;  %1899 = vpow2.f32 %v1122_v60  ;;  %v953_v8 = vmax.f32 %v951_v50, %v952_v41 }
 0x205   : > { %v1235_v9 = vadd.f32 %v1234_v40, %v1233_v56  ;;  %v1243_v12 = vsel %vm845_vm1, %v2427_v2, 0.0  ;;  %1901 = vpow2.f32 %v1128_v1  ;;  %v936_v14 = vmax.f32 %v934_v61, %v935_v22 }
 0x206   : > { %1461 = vst.msk [vmem:[%s2366_s10 + $0x38] sm:$0xff] %vm845_vm1, %v1405_v42  ;;  %v1228_v16 = vadd.f32 %v1227_v57, %v1226_v18  ;;  %v1244_v37 = vrot.slane %v1243_v12, 4  ;;  %v954_v19 = vrot.slane %v953_v8, 2  ;;  %v944_v11 = vsel %vm845_vm1, %v827_v0, -inf }
 0x207   : > { %1903 = vrcp.f32 %v1235_v9  ;;  %v1082_v25 = vsub.f32 %v825_v46, %v936_v14  ;;  %v945_v21 = vrot.slane %v944_v11, 4  ;;  %v830_v23 = vmax.f32 %v2425_v6, 0.0 }
 0x208   : > { %v1898_v26 = vpop.eup %1897  ;;  %1905 = vrcp.f32 %v1228_v16  ;;  %v1245_v28 = vadd.f32 %v1244_v37, %v1243_v12  ;;  %v955_v53 = vmax.f32 %v953_v8, %v954_v19  ;;  %v2442_v32 = vadd.f32 %v2194_v29, %v2289_v27 }
 0x209   : > { %v1403_v35 = vmul.f32 %v1898_v26, %v2338_v55  ;;  %v1126_v38 = vmul.f32 1.442695, %v1082_v25  ;;  %v946_v36 = vmax.f32 %v944_v11, %v945_v21  ;;  %v965_v31 = vsel %vm845_vm1, %v830_v23, -inf }
 0x20a   : > { %v1246_v46 = vrot.slane %v1245_v28, 2  ;;  %v956_v34 = vrot.slane %v955_v53, 1  ;;  %v966_v7 = vrot.slane %v965_v31, 4  ;;  %v829_v13 = vmax.f32 %v2442_v32, 0.0 }
 0x20b   : > { %1460 = vst.msk [vmem:[%s2366_s10 + $0x30] sm:$0xff] %vm845_vm1, %v1403_v35  ;;  %1907 = vpow2.f32 %v1126_v38  ;;  %v947_v30 = vrot.slane %v946_v36, 2  ;;  %v2453_v27 = vadd.f32 %v2301_v59, %v2194_v29  ;;  %v2457_v55 = vadd.f32 %v2194_v29, %v2307_v48 }
 0x20c   : > { %v1247_v47 = vadd.f32 %v1246_v46, %v1245_v28  ;;  %v957_v50 = vmax.f32 %v955_v53, %v956_v34  ;;  %v967_v51 = vmax.f32 %v965_v31, %v966_v7  ;;  %v958_v56 = vsel %vm845_vm1, %v829_v13, -inf }
 0x20d   : > { %v948_v49 = vmax.f32 %v946_v36, %v947_v30  ;;  %v959_v61 = vrot.slane %v958_v56, 4  ;;  %v832_v18 = vmax.f32 %v2453_v27, 0.0  ;;  %v831_v60 = vmax.f32 %v2457_v55, 0.0 }
 0x20e   : > { %v2464_v41 = vpop.eup %1899  ;;  %v1248_v59 = vrot.slane %v1247_v47, 1  ;;  %v1085_v48 = vsub.f32 %v828_v33, %v957_v50  ;;  %v968_v17 = vrot.slane %v967_v51, 2  ;;  %v2470_v40 = vadd.f32 %v2314_v5, %v2194_v29 }
 0x20f   : > { %v2472_v1 = vpop.eup %1901  ;;  %v1236_v22 = vsel %vm845_vm1, %v2464_v41, 0.0  ;;  %v949_v42 = vrot.slane %v948_v49, 1  ;;  %v960_v57 = vmax.f32 %v958_v56, %v959_v61  ;;  %v979_v8 = vsel %vm845_vm1, %v832_v18, -inf }
 0x210   : > { %v1249_v9 = vadd.f32 %v1248_v59, %v1247_v47  ;;  %v1237_v12 = vrot.slane %v1236_v22, 4  ;;  %v1257_v62 = vsel %vm845_vm1, %v2472_v1, 0.0  ;;  %v1132_v33 = vmul.f32 1.442695, %v1085_v48 }
 0x211   : > { %v1904_v5 = vpop.eup %1903  ;;  %v1258_v14 = vrot.slane %v1257_v62, 4  ;;  %v950_v16 = vmax.f32 %v948_v49, %v949_v42  ;;  %v969_v37 = vmax.f32 %v967_v51, %v968_v17  ;;  %v961_v19 = vrot.slane %v960_v57, 2 }
 0x212   : > { %v1906_v11 = vpop.eup %1905  ;;  %v1409_v25 = vmul.f32 %v1904_v5, %v2378_v3  ;;  %1909 = vrcp.f32 %v1249_v9  ;;  %v1238_v21 = vadd.f32 %v1237_v12, %v1236_v22  ;;  %v980_v26 = vrot.slane %v979_v8, 4 }
 0x213   : > { %v1407_v28 = vmul.f32 %v1906_v11, %v2384_v58  ;;  %v1259_v53 = vadd.f32 %v1258_v14, %v1257_v62  ;;  %1911 = vpow2.f32 %v1132_v33  ;;  %v1084_v35 = vsub.f32 %v827_v0, %v950_v16 }
 0x214   : > { %1463 = vst.msk [vmem:[%s2366_s10 + $0x48] sm:$0xff] %vm845_vm1, %v1409_v25  ;;  %v1239_v38 = vrot.slane %v1238_v21, 2  ;;  %v970_v36 = vrot.slane %v969_v37, 1  ;;  %v962_v31 = vmax.f32 %v960_v57, %v961_v19  ;;  %v981_v46 = vmax.f32 %v979_v8, %v980_v26 }
 0x215   : > { %v2487_v34 = vpop.eup %1907  ;;  %1462 = vst.msk [vmem:[%s2366_s10 + $0x40] sm:$0xff] %vm845_vm1, %v1407_v28  ;;  %v1260_v3 = vrot.slane %v1259_v53, 2  ;;  %v1130_v7 = vmul.f32 1.442695, %v1084_v35  ;;  %v972_v58 = vsel %vm845_vm1, %v831_v60, -inf  ;;  %v834_v30 = vmax.f32 %v2470_v40, 0.0 }
 0x216   : > { %v1240_v44 = vadd.f32 %v1239_v38, %v1238_v21  ;;  %v1250_v0 = vsel %vm845_vm1, %v2487_v34, 0.0  ;;  %v971_v47 = vmax.f32 %v969_v37, %v970_v36  ;;  %v963_v50 = vrot.slane %v962_v31, 1 }
 0x217   : > { %v1261_v51 = vadd.f32 %v1260_v3, %v1259_v53  ;;  %v1251_v56 = vrot.slane %v1250_v0, 4  ;;  %1913 = vpow2.f32 %v1130_v7  ;;  %v982_v49 = vrot.slane %v981_v46, 2 }
 0x218   : > { %v1241_v61 = vrot.slane %v1240_v44, 1  ;;  %v1087_v59 = vsub.f32 %v830_v23, %v971_v47  ;;  %v964_v48 = vmax.f32 %v962_v31, %v963_v50  ;;  %v973_v17 = vrot.slane %v972_v58, 4 }
 0x219   : > { %v1262_v22 = vrot.slane %v1261_v51, 1  ;;  %v1252_v42 = vadd.f32 %v1251_v56, %v1250_v0  ;;  %v983_v57 = vmax.f32 %v981_v46, %v982_v49  ;;  %v993_v8 = vsel %vm845_vm1, %v834_v30, -inf }
 0x21a   : > { %v1242_v9 = vadd.f32 %v1241_v61, %v1240_v44  ;;  %v1136_v12 = vmul.f32 1.442695, %v1087_v59  ;;  %v1086_v62 = vsub.f32 %v829_v13, %v964_v48  ;;  %v974_v33 = vmax.f32 %v972_v58, %v973_v17 }
 0x21b   : > { %v1263_v5 = vadd.f32 %v1262_v22, %v1261_v51  ;;  %v1253_v14 = vrot.slane %v1252_v42, 2  ;;  %v984_v16 = vrot.slane %v983_v57, 1  ;;  %v994_v6 = vrot.slane %v993_v8, 4 }
 0x21c   : > { %v1910_v23 = vpop.eup %1909  ;;  %1915 = vrcp.f32 %v1242_v9  ;;  %v1134_v37 = vmul.f32 1.442695, %v1086_v62  ;;  %v975_v19 = vrot.slane %v974_v33, 2  ;;  %v2506_v11 = vadd.f32 %v2194_v29, %v2322_v10 }
 0x21d   : > { %v2508_v25 = vpop.eup %1911  ;;  %v1413_v21 = vmul.f32 %v1910_v23, %v2427_v2  ;;  %1917 = vrcp.f32 %v1263_v5  ;;  %v1254_v32 = vadd.f32 %v1253_v14, %v1252_v42  ;;  %v985_v13 = vmax.f32 %v983_v57, %v984_v16 }
 0x21e   : > { %v1271_v26 = vsel %vm845_vm1, %v2508_v25, 0.0  ;;  %1919 = vpow2.f32 %v1136_v12  ;;  %v976_v28 = vmax.f32 %v974_v33, %v975_v19  ;;  %v995_v53 = vmax.f32 %v993_v8, %v994_v6 }
 0x21f   : > { %1465 = vst.msk [vmem:[%s2366_s10 + $0x58] sm:$0xff] %vm845_vm1, %v1413_v21  ;;  %v1255_v35 = vrot.slane %v1254_v32, 1  ;;  %v1272_v38 = vrot.slane %v1271_v26, 4  ;;  %1921 = vpow2.f32 %v1134_v37  ;;  %v1089_v10 = vsub.f32 %v832_v18, %v985_v13 }
 0x220   : > { %v977_v36 = vrot.slane %v976_v28, 1  ;;  %v996_v31 = vrot.slane %v995_v53, 2  ;;  %v833_v2 = vmax.f32 %v2506_v11, 0.0  ;;  %v2520_v46 = vadd.f32 %v2330_v63, %v2194_v29 }
 0x221   : > { %v2522_v3 = vpop.eup %1913  ;;  %v1256_v7 = vadd.f32 %v1255_v35, %v1254_v32  ;;  %v1273_v58 = vadd.f32 %v1272_v38, %v1271_v26  ;;  %v1140_v44 = vmul.f32 1.442695, %v1089_v10  ;;  %v2526_v0 = vadd.f32 %v2194_v29, %v2334_v39 }
 0x222   : > { %v1264_v27 = vsel %vm845_vm1, %v2522_v3, 0.0  ;;  %v978_v18 = vmax.f32 %v976_v28, %v977_v36  ;;  %v997_v47 = vmax.f32 %v995_v53, %v996_v31  ;;  %v986_v50 = vsel %vm845_vm1, %v833_v2, -inf }
 0x223   : > { %1923 = vrcp.f32 %v1256_v7  ;;  %v1274_v63 = vrot.slane %v1273_v58, 2  ;;  %v1265_v51 = vrot.slane %v1264_v27, 4  ;;  %v987_v56 = vrot.slane %v986_v50, 4 }
 0x224   : > { %1925 = vpow2.f32 %v1140_v44  ;;  %v1088_v49 = vsub.f32 %v831_v60, %v978_v18  ;;  %v998_v61 = vrot.slane %v997_v47, 1  ;;  %v836_v39 = vmax.f32 %v2520_v46, 0.0 }
 0x225   : > { %v1275_v59 = vadd.f32 %v1274_v63, %v1273_v58  ;;  %v1266_v48 = vadd.f32 %v1265_v51, %v1264_v27  ;;  %v988_v17 = vmax.f32 %v986_v50, %v987_v56  ;;  %v835_v22 = vmax.f32 %v2526_v0, 0.0 }
 0x226   : > { %v1916_v42 = vpop.eup %1915  ;;  %v1138_v57 = vmul.f32 1.442695, %v1088_v49  ;;  %v999_v8 = vmax.f32 %v997_v47, %v998_v61  ;;  %v1007_v9 = vsel %vm845_vm1, %v836_v39, -inf  ;;  %v2542_v55 = vadd.f32 %v2336_v52, %v2194_v29 }
 0x227   : > { %v1918_v60 = vpop.eup %1917  ;;  %v1411_v12 = vmul.f32 %v1916_v42, %v2464_v41  ;;  %v1276_v62 = vrot.slane %v1275_v59, 1  ;;  %v1267_v33 = vrot.slane %v1266_v48, 2  ;;  %v989_v5 = vrot.slane %v988_v17, 2  ;;  %v2579_v42 = vld [vmem:[%s2752_s2 + $0x80] ss:$0 sm:$0xff] }
 0x228   : > { %v2545_v14 = vpop.eup %1919  ;;  %v1417_v16 = vmul.f32 %v1918_v60, %v2472_v1  ;;  %1927 = vpow2.f32 %v1138_v57  ;;  %v1091_v6 = vsub.f32 %v834_v30, %v999_v8  ;;  %v1008_v23 = vrot.slane %v1007_v9, 4 }
 0x229   : > { %v2550_v37 = vpop.eup %1921  ;;  %1464 = vst.msk [vmem:[%s2366_s10 + $0x50] sm:$0xff] %vm845_vm1, %v1411_v12  ;;  %v1277_v29 = vadd.f32 %v1276_v62, %v1275_v59  ;;  %v1268_v52 = vadd.f32 %v1267_v33, %v1266_v48  ;;  %v1285_v41 = vsel %vm845_vm1, %v2545_v14, 0.0  ;;  %v990_v19 = vmax.f32 %v988_v17, %v989_v5 }
 0x22a   : > { %1467 = vst.msk [vmem:[%s2366_s10 + $0x68] sm:$0xff] %vm845_vm1, %v1417_v16  ;;  %v1286_v21 = vrot.slane %v1285_v41, 4  ;;  %v1278_v1 = vsel %vm845_vm1, %v2550_v37, 0.0  ;;  %v1144_v32 = vmul.f32 1.442695, %v1091_v6  ;;  %v1009_v40 = vmax.f32 %v1007_v9, %v1008_v23 }
 0x22b   : > { %1929 = vrcp.f32 %v1277_v29  ;;  %v1269_v30 = vrot.slane %v1268_v52, 1  ;;  %v1279_v13 = vrot.slane %v1278_v1, 4  ;;  %v991_v26 = vrot.slane %v990_v19, 1 }
 0x22c   : > { %v1287_v28 = vadd.f32 %v1286_v21, %v1285_v41  ;;  %1931 = vpow2.f32 %v1144_v32  ;;  %v1010_v53 = vrot.slane %v1009_v40, 2  ;;  %v1000_v35 = vsel %vm845_vm1, %v835_v22, -inf }
 0x22d   : > { %v1924_v38 = vpop.eup %1923  ;;  %v1270_v10 = vadd.f32 %v1269_v30, %v1268_v52  ;;  %v1280_v36 = vadd.f32 %v1279_v13, %v1278_v1  ;;  %v992_v31 = vmax.f32 %v990_v19, %v991_v26  ;;  %v1001_v7 = vrot.slane %v1000_v35, 4 }
 0x22e   : > { %v2563_v58 = vpop.eup %1925  ;;  %v1415_v44 = vmul.f32 %v1924_v38, %v2487_v34  ;;  %v1288_v27 = vrot.slane %v1287_v28, 2  ;;  %v1011_v18 = vmax.f32 %v1009_v40, %v1010_v53  ;;  %v838_v47 = vmax.f32 %v2542_v55, 0.0 }
 0x22f   : > { %1933 = vrcp.f32 %v1270_v10  ;;  %v1281_v50 = vrot.slane %v1280_v36, 2  ;;  %v1299_v63 = vsel %vm845_vm1, %v2563_v58, 0.0  ;;  %v1090_v51 = vsub.f32 %v833_v2, %v992_v31 }
 0x230   : > { %1466 = vst.msk [vmem:[%s2366_s10 + $0x60] sm:$0xff] %vm845_vm1, %v1415_v44  ;;  %v1289_v56 = vadd.f32 %v1288_v27, %v1287_v28  ;;  %v1300_v49 = vrot.slane %v1299_v63, 4  ;;  %v1012_v61 = vrot.slane %v1011_v18, 1  ;;  %v1002_v59 = vmax.f32 %v1000_v35, %v1001_v7 }
 0x231   : > { %v1282_v48 = vadd.f32 %v1281_v50, %v1280_v36  ;;  %v1142_v34 = vmul.f32 1.442695, %v1090_v51  ;;  %v1021_v17 = vsel %vm845_vm1, %v838_v47, -inf  ;;  %v2583_v11 = vadd.f32 %v2579_v42, %v2341_v45 }
 0x232   : > { %v2585_v2 = vpop.eup %1927  ;;  %v1290_v57 = vrot.slane %v1289_v56, 1  ;;  %v1301_v8 = vadd.f32 %v1300_v49, %v1299_v63  ;;  %v1013_v9 = vmax.f32 %v1011_v18, %v1012_v61  ;;  %v1003_v60 = vrot.slane %v1002_v59, 2 }
 0x233   : > { %v1283_v12 = vrot.slane %v1282_v48, 1  ;;  %v1292_v62 = vsel %vm845_vm1, %v2585_v2, 0.0  ;;  %1935 = vpow2.f32 %v1142_v34  ;;  %v1022_v33 = vrot.slane %v1021_v17, 4 }
 0x234   : > { %v1291_v5 = vadd.f32 %v1290_v57, %v1289_v56  ;;  %v1302_v16 = vrot.slane %v1301_v8, 2  ;;  %v1293_v6 = vrot.slane %v1292_v62, 4  ;;  %v1093_v45 = vsub.f32 %v836_v39, %v1013_v9 }
 0x235   : > { %v1930_v23 = vpop.eup %1929  ;;  %v1284_v29 = vadd.f32 %v1283_v12, %v1282_v48  ;;  %v1004_v52 = vmax.f32 %v1002_v59, %v1003_v60  ;;  %v1023_v41 = vmax.f32 %v1021_v17, %v1022_v33  ;;  %v837_v19 = vmax.f32 %v2583_v11, 0.0 }
 0x236   : > { %v2592_v21 = vpop.eup %1931  ;;  %v1421_v1 = vmul.f32 %v1930_v23, %v2508_v25  ;;  %1937 = vrcp.f32 %v1291_v5  ;;  %v1303_v32 = vadd.f32 %v1302_v16, %v1301_v8  ;;  %v1294_v40 = vadd.f32 %v1293_v6, %v1292_v62 }
 0x237   : > { %1939 = vrcp.f32 %v1284_v29  ;;  %v1313_v30 = vsel %vm845_vm1, %v2592_v21, 0.0  ;;  %v1148_v46 = vmul.f32 1.442695, %v1093_v45  ;;  %v1005_v13 = vrot.slane %v1004_v52, 1 }
 0x238   : > { %1469 = vst.msk [vmem:[%s2366_s10 + $0x78] sm:$0xff] %vm845_vm1, %v1421_v1  ;;  %v1304_v39 = vrot.slane %v1303_v32, 1  ;;  %v1295_v26 = vrot.slane %v1294_v40, 2  ;;  %v1314_v28 = vrot.slane %v1313_v30, 4  ;;  %v1024_v53 = vrot.slane %v1023_v41, 2 }
 0x239   : > { %v1934_v35 = vpop.eup %1933  ;;  %1941 = vpow2.f32 %v1148_v46  ;;  %v1006_v38 = vmax.f32 %v1004_v52, %v1005_v13  ;;  %v1014_v25 = vsel %vm845_vm1, %v837_v19, -inf  ;;  %v2604_v10 = vadd.f32 %v2579_v42, %v2351_v4 }
 0x23a   : > { %v1419_v36 = vmul.f32 %v1934_v35, %v2522_v3  ;;  %v1305_v31 = vadd.f32 %v1304_v39, %v1303_v32  ;;  %v1296_v7 = vadd.f32 %v1295_v26, %v1294_v40  ;;  %v1315_v44 = vadd.f32 %v1314_v28, %v1313_v30 }
 0x23b   : > { %v1092_v27 = vsub.f32 %v835_v22, %v1006_v38  ;;  %v1025_v18 = vmax.f32 %v1023_v41, %v1024_v53  ;;  %v1015_v50 = vrot.slane %v1014_v25, 4  ;;  %v840_v63 = vmax.f32 %v2604_v10, 0.0 }
 0x23c   : > { %1468 = vst.msk [vmem:[%s2366_s10 + $0x70] sm:$0xff] %vm845_vm1, %v1419_v36  ;;  %1943 = vrcp.f32 %v1305_v31  ;;  %v1297_v51 = vrot.slane %v1296_v7, 1  ;;  %v1316_v56 = vrot.slane %v1315_v44, 2  ;;  %v2614_v4 = vadd.f32 %v2579_v42, %v2353_v24 }
 0x23d   : > { %v2616_v3 = vpop.eup %1935  ;;  %v1146_v49 = vmul.f32 1.442695, %v1092_v27  ;;  %v1026_v61 = vrot.slane %v1025_v18, 1  ;;  %v1016_v59 = vmax.f32 %v1014_v25, %v1015_v50  ;;  %v1035_v0 = vsel %vm845_vm1, %v840_v63, -inf }
 0x23e   : > { %v1298_v22 = vadd.f32 %v1297_v51, %v1296_v7  ;;  %v1317_v48 = vadd.f32 %v1316_v56, %v1315_v44  ;;  %v1306_v34 = vsel %vm845_vm1, %v2616_v3, 0.0  ;;  %v1036_v17 = vrot.slane %v1035_v0, 4 }
 0x23f   : > { %v1307_v57 = vrot.slane %v1306_v34, 4  ;;  %1945 = vpow2.f32 %v1146_v49  ;;  %v1027_v8 = vmax.f32 %v1025_v18, %v1026_v61  ;;  %v1017_v24 = vrot.slane %v1016_v59, 2 }
 0x240   : > { %v1938_v9 = vpop.eup %1937  ;;  %1947 = vrcp.f32 %v1298_v22  ;;  %v1318_v60 = vrot.slane %v1317_v48, 1  ;;  %v1037_v12 = vmax.f32 %v1035_v0, %v1036_v17  ;;  %v839_v62 = vmax.f32 %v2614_v4, 0.0 }
 0x241   : > { %v1940_v33 = vpop.eup %1939  ;;  %v1425_v5 = vmul.f32 %v1938_v9, %v2545_v14  ;;  %v1308_v16 = vadd.f32 %v1307_v57, %v1306_v34  ;;  %v1095_v6 = vsub.f32 %v838_v47, %v1027_v8  ;;  %v1018_v45 = vmax.f32 %v1016_v59, %v1017_v24 }
 0x242   : > { %v1423_v23 = vmul.f32 %v1940_v33, %v2550_v37  ;;  %v1319_v29 = vadd.f32 %v1318_v60, %v1317_v48  ;;  %v1038_v52 = vrot.slane %v1037_v12, 2  ;;  %v1028_v41 = vsel %vm845_vm1, %v839_v62, -inf }
 0x243   : > { %v2631_v1 = vpop.eup %1941  ;;  %1471 = vst.msk [vmem:[%s2366_s10 + $0x88] sm:$0xff] %vm845_vm1, %v1425_v5  ;;  %v1309_v32 = vrot.slane %v1308_v16, 2  ;;  %v1152_v40 = vmul.f32 1.442695, %v1095_v6  ;;  %v1019_v14 = vrot.slane %v1018_v45, 1  ;;  %v1029_v30 = vrot.slane %v1028_v41, 4 }
 0x244   : > { %1470 = vst.msk [vmem:[%s2366_s10 + $0x80] sm:$0xff] %vm845_vm1, %v1423_v23  ;;  %1949 = vrcp.f32 %v1319_v29  ;;  %v1327_v55 = vsel %vm845_vm1, %v2631_v1, 0.0  ;;  %v1039_v37 = vmax.f32 %v1037_v12, %v1038_v52  ;;  %v2641_v47 = vadd.f32 %v2579_v42, %v2373_v15 }
 0x245   : > { %v1310_v46 = vadd.f32 %v1309_v32, %v1308_v16  ;;  %v1328_v13 = vrot.slane %v1327_v55, 4  ;;  %1951 = vpow2.f32 %v1152_v40  ;;  %v1020_v39 = vmax.f32 %v1018_v45, %v1019_v14 }
 0x246   : > { %v1944_v26 = vpop.eup %1943  ;;  %v1040_v28 = vrot.slane %v1039_v37, 1  ;;  %v1030_v53 = vmax.f32 %v1028_v41, %v1029_v30  ;;  %v842_v35 = vmax.f32 %v2641_v47, 0.0  ;;  %v2646_v38 = vadd.f32 %v2579_v42, %v2376_v43 }
 0x247   : > { %v1429_v25 = vmul.f32 %v1944_v26, %v2563_v58  ;;  %v1311_v36 = vrot.slane %v1310_v46, 1  ;;  %v1329_v31 = vadd.f32 %v1328_v13, %v1327_v55  ;;  %v1094_v15 = vsub.f32 %v837_v19, %v1020_v39 }
 0x248   : > { %v1041_v7 = vmax.f32 %v1039_v37, %v1040_v28  ;;  %v1031_v44 = vrot.slane %v1030_v53, 2  ;;  %v1049_v27 = vsel %vm845_vm1, %v842_v35, -inf  ;;  %v841_v18 = vmax.f32 %v2646_v38, 0.0 }
 0x249   : > { %v2655_v50 = vpop.eup %1945  ;;  %1473 = vst.msk [vmem:[%s2366_s10 + $0x98] sm:$0xff] %vm845_vm1, %v1429_v25  ;;  %v1312_v43 = vadd.f32 %v1311_v36, %v1310_v46  ;;  %v1330_v51 = vrot.slane %v1329_v31, 2  ;;  %v1150_v58 = vmul.f32 1.442695, %v1094_v15  ;;  %v1050_v56 = vrot.slane %v1049_v27, 4 }
 0x24a   : > { %v1948_v49 = vpop.eup %1947  ;;  %v1320_v11 = vsel %vm845_vm1, %v2655_v50, 0.0  ;;  %v1097_v19 = vsub.f32 %v840_v63, %v1041_v7  ;;  %v1032_v61 = vmax.f32 %v1030_v53, %v1031_v44  ;;  %v1042_v59 = vsel %vm845_vm1, %v841_v18, -inf }
 0x24b   : > { %v1427_v0 = vmul.f32 %v1948_v49, %v2585_v2  ;;  %1953 = vrcp.f32 %v1312_v43  ;;  %v1331_v22 = vadd.f32 %v1330_v51, %v1329_v31  ;;  %v1321_v48 = vrot.slane %v1320_v11, 4 }
 0x24c   : > { %1955 = vpow2.f32 %v1150_v58  ;;  %v1156_v34 = vmul.f32 1.442695, %v1097_v19  ;;  %v1033_v17 = vrot.slane %v1032_v61, 1  ;;  %v1051_v57 = vmax.f32 %v1049_v27, %v1050_v56 }
 0x24d   : > { %1472 = vst.msk [vmem:[%s2366_s10 + $0x90] sm:$0xff] %vm845_vm1, %v1427_v0  ;;  %v1332_v8 = vrot.slane %v1331_v22, 1  ;;  %v1322_v24 = vadd.f32 %v1321_v48, %v1320_v11  ;;  %v1043_v10 = vrot.slane %v1042_v59, 4  ;;  %v2671_v63 = vadd.f32 %v2579_v42, %v2394_v54 }
 0x24e   : > { %v1950_v9 = vpop.eup %1949  ;;  %1957 = vpow2.f32 %v1156_v34  ;;  %v1034_v2 = vmax.f32 %v1032_v61, %v1033_v17  ;;  %v1052_v60 = vrot.slane %v1051_v57, 2  ;;  %v2675_v12 = vadd.f32 %v2579_v42, %v2397_v20 }
 0x24f   : > { %v2677_v33 = vpop.eup %1951  ;;  %v1433_v5 = vmul.f32 %v1950_v9, %v2592_v21  ;;  %v1333_v16 = vadd.f32 %v1332_v8, %v1331_v22  ;;  %v1323_v6 = vrot.slane %v1322_v24, 2  ;;  %v1044_v45 = vmax.f32 %v1042_v59, %v1043_v10 }
 0x250   : > { %v1341_v23 = vsel %vm845_vm1, %v2677_v33, 0.0  ;;  %v1096_v54 = vsub.f32 %v839_v62, %v1034_v2  ;;  %v1053_v29 = vmax.f32 %v1051_v57, %v1052_v60  ;;  %v844_v52 = vmax.f32 %v2671_v63, 0.0 }
 0x251   : > { %1475 = vst.msk [vmem:[%s2366_s10 + $0xa8] sm:$0xff] %vm845_vm1, %v1433_v5  ;;  %1959 = vrcp.f32 %v1333_v16  ;;  %v1324_v20 = vadd.f32 %v1323_v6, %v1322_v24  ;;  %v1342_v42 = vrot.slane %v1341_v23, 4  ;;  %v1045_v41 = vrot.slane %v1044_v45, 2 }
 0x252   : > { %v1154_v32 = vmul.f32 1.442695, %v1096_v54  ;;  %v1054_v21 = vrot.slane %v1053_v29, 1  ;;  %v1063_v40 = vsel %vm845_vm1, %v844_v52, -inf  ;;  %v843_v14 = vmax.f32 %v2675_v12, 0.0 }
 0x253   : > { %v1325_v30 = vrot.slane %v1324_v20, 1  ;;  %v1343_v4 = vadd.f32 %v1342_v42, %v1341_v23  ;;  %v1046_v62 = vmax.f32 %v1044_v45, %v1045_v41  ;;  %v1064_v55 = vrot.slane %v1063_v40, 4 }
 0x254   : > { %1961 = vpow2.f32 %v1154_v32  ;;  %v1055_v37 = vmax.f32 %v1053_v29, %v1054_v21  ;;  %v1056_v46 = vsel %vm845_vm1, %v843_v14, -inf }
 0x255   : > { %v1954_v13 = vpop.eup %1953  ;;  %v1326_v39 = vadd.f32 %v1325_v30, %v1324_v20  ;;  %v1344_v26 = vrot.slane %v1343_v4, 2  ;;  %v1047_v28 = vrot.slane %v1046_v62, 1  ;;  %v1065_v53 = vmax.f32 %v1063_v40, %v1064_v55 }
 0x256   : > { %v2694_v25 = vpop.eup %1955  ;;  %v1431_v36 = vmul.f32 %v1954_v13, %v2616_v3  ;;  %v1099_v31 = vsub.f32 %v842_v35, %v1055_v37  ;;  %v1057_v15 = vrot.slane %v1056_v46, 4 }
 0x257   : > { %1963 = vrcp.f32 %v1326_v39  ;;  %v1345_v7 = vadd.f32 %v1344_v26, %v1343_v4  ;;  %v1334_v44 = vsel %vm845_vm1, %v2694_v25, 0.0  ;;  %v1048_v27 = vmax.f32 %v1046_v62, %v1047_v28 }
 0x258   : > { %v2701_v43 = vpop.eup %1957  ;;  %1474 = vst.msk [vmem:[%s2366_s10 + $0xa0] sm:$0xff] %vm845_vm1, %v1431_v36  ;;  %v1335_v51 = vrot.slane %v1334_v44, 4  ;;  %v1160_v58 = vmul.f32 1.442695, %v1099_v31  ;;  %v1066_v56 = vrot.slane %v1065_v53, 2  ;;  %v1058_v49 = vmax.f32 %v1056_v46, %v1057_v15 }
 0x259   : > { %v1346_v11 = vrot.slane %v1345_v7, 1  ;;  %v1355_v3 = vsel %vm845_vm1, %v2701_v43, 0.0  ;;  %v1098_v47 = vsub.f32 %v841_v18, %v1048_v27 }
 0x25a   : > { %v1336_v35 = vadd.f32 %v1335_v51, %v1334_v44  ;;  %v1356_v19 = vrot.slane %v1355_v3, 4  ;;  %1965 = vpow2.f32 %v1160_v58  ;;  %v1067_v61 = vmax.f32 %v1065_v53, %v1066_v56 }
 0x25b   : > { %v1960_v59 = vpop.eup %1959  ;;  %v1347_v0 = vadd.f32 %v1346_v11, %v1345_v7  ;;  %v1158_v22 = vmul.f32 1.442695, %v1098_v47  ;;  %v1059_v48 = vrot.slane %v1058_v49, 2 }
 0x25c   : > { %v1437_v34 = vmul.f32 %v1960_v59, %v2631_v1  ;;  %v1337_v17 = vrot.slane %v1336_v35, 2  ;;  %v1357_v57 = vadd.f32 %v1356_v19, %v1355_v3  ;;  %v1068_v8 = vrot.slane %v1067_v61, 1 }
 0x25d   : > { %1967 = vrcp.f32 %v1347_v0  ;;  %v1060_v24 = vmax.f32 %v1058_v49, %v1059_v48 }
 0x25e   : > { %v2710_v10 = vpop.eup %1961  ;;  %1477 = vst.msk [vmem:[%s2366_s10 + $0xb8] sm:$0xff] %vm845_vm1, %v1437_v34  ;;  %v1338_v38 = vadd.f32 %v1337_v17, %v1336_v35  ;;  %v1358_v18 = vrot.slane %v1357_v57, 2  ;;  %1969 = vpow2.f32 %v1158_v22  ;;  %v1069_v9 = vmax.f32 %v1067_v61, %v1068_v8 }
 0x25f   : > { %v1348_v2 = vsel %vm845_vm1, %v2710_v10, 0.0  ;;  %v1061_v60 = vrot.slane %v1060_v24, 1 }
 0x260   : > { %v1339_v5 = vrot.slane %v1338_v38, 1  ;;  %v1359_v1 = vadd.f32 %v1358_v18, %v1357_v57  ;;  %v1349_v16 = vrot.slane %v1348_v2, 4  ;;  %v1101_v6 = vsub.f32 %v844_v52, %v1069_v9 }
 0x261   : > { %v1964_v45 = vpop.eup %1963  ;;  %v1062_v23 = vmax.f32 %v1060_v24, %v1061_v60 }
 0x262   : > { %v1435_v54 = vmul.f32 %v1964_v45, %v2655_v50  ;;  %v1340_v29 = vadd.f32 %v1339_v5, %v1338_v38  ;;  %v1360_v20 = vrot.slane %v1359_v1, 1  ;;  %v1350_v42 = vadd.f32 %v1349_v16, %v1348_v2 }
 0x263   : > { %v1164_v41 = vmul.f32 1.442695, %v1101_v6  ;;  %v1100_v32 = vsub.f32 %v843_v14, %v1062_v23 }
 0x264   : > { %v1966_v21 = vpop.eup %1965  ;;  %1476 = vst.msk [vmem:[%s2366_s10 + $0xb0] sm:$0xff] %vm845_vm1, %v1435_v54  ;;  %1971 = vrcp.f32 %v1340_v29  ;;  %v1361_v40 = vadd.f32 %v1360_v20, %v1359_v1  ;;  %v1351_v30 = vrot.slane %v1350_v42, 2 }
 0x265   : > { %v1369_v63 = vsel %vm845_vm1, %v1966_v21, 0.0  ;;  %1973 = vpow2.f32 %v1164_v41  ;;  %v1162_v52 = vmul.f32 1.442695, %v1100_v32 }
 0x266   : > { %1975 = vrcp.f32 %v1361_v40  ;;  %v1352_v50 = vadd.f32 %v1351_v30, %v1350_v42  ;;  %v1370_v4 = vrot.slane %v1369_v63, 4 }
 0x267   : > { %v1968_v62 = vpop.eup %1967  ;;  %1977 = vpow2.f32 %v1162_v52 }
 0x268   : > { %v1970_v55 = vpop.eup %1969  ;;  %v1441_v12 = vmul.f32 %v1968_v62, %v2677_v33  ;;  %v1353_v14 = vrot.slane %v1352_v50, 1  ;;  %v1371_v37 = vadd.f32 %v1370_v4, %v1369_v63 }
 0x269   : > { %v1362_v46 = vsel %vm845_vm1, %v1970_v55, 0.0 }
 0x26a   : > { %1479 = vst.msk [vmem:[%s2366_s10 + $0xc8] sm:$0xff] %vm845_vm1, %v1441_v12  ;;  %v1354_v13 = vadd.f32 %v1353_v14, %v1352_v50  ;;  %v1372_v39 = vrot.slane %v1371_v37, 2  ;;  %v1363_v26 = vrot.slane %v1362_v46, 4 }
 0x26c   : > { %1979 = vrcp.f32 %v1354_v13  ;;  %v1373_v28 = vadd.f32 %v1372_v39, %v1371_v37  ;;  %v1364_v53 = vadd.f32 %v1363_v26, %v1362_v46 }
 0x26e   : > { %v1972_v36 = vpop.eup %1971  ;;  %v1374_v31 = vrot.slane %v1373_v28, 1  ;;  %v1365_v15 = vrot.slane %v1364_v53, 2 }
 0x26f   : > { %v1974_v7 = vpop.eup %1973  ;;  %v1439_v33 = vmul.f32 %v1972_v36, %v2694_v25 }
 0x270   : > { %v1976_v44 = vpop.eup %1975  ;;  %v1375_v27 = vadd.f32 %v1374_v31, %v1373_v28  ;;  %v1366_v51 = vadd.f32 %v1365_v15, %v1364_v53  ;;  %v1383_v58 = vsel %vm845_vm1, %v1974_v7, 0.0 }
 0x271   : > { %v1978_v56 = vpop.eup %1977  ;;  %1478 = vst.msk [vmem:[%s2366_s10 + $0xc0] sm:$0xff] %vm845_vm1, %v1439_v33  ;;  %v1445_v49 = vmul.f32 %v1976_v44, %v2701_v43  ;;  %v1384_v11 = vrot.slane %v1383_v58, 4 }
 0x272   : > { %1981 = vrcp.f32 %v1375_v27  ;;  %v1367_v3 = vrot.slane %v1366_v51, 1  ;;  %v1376_v47 = vsel %vm845_vm1, %v1978_v56, 0.0 }
 0x273   : > { %1481 = vst.msk [vmem:[%s2366_s10 + $0xd8] sm:$0xff] %vm845_vm1, %v1445_v49  ;;  %v1385_v35 = vadd.f32 %v1384_v11, %v1383_v58  ;;  %v1377_v25 = vrot.slane %v1376_v47, 4 }
 0x274   : > { %v1368_v19 = vadd.f32 %v1367_v3, %v1366_v51 }
 0x275   : > { %v1386_v61 = vrot.slane %v1385_v35, 2  ;;  %v1378_v59 = vadd.f32 %v1377_v25, %v1376_v47 }
 0x276   : > { %v1980_v0 = vpop.eup %1979  ;;  %1983 = vrcp.f32 %v1368_v19 }
 0x277   : > { %v1443_v22 = vmul.f32 %v1980_v0, %v2710_v10  ;;  %v1387_v43 = vadd.f32 %v1386_v61, %v1385_v35  ;;  %v1379_v48 = vrot.slane %v1378_v59, 2 }
 0x279   : > { %1480 = vst.msk [vmem:[%s2366_s10 + $0xd0] sm:$0xff] %vm845_vm1, %v1443_v22  ;;  %v1388_v34 = vrot.slane %v1387_v43, 1  ;;  %v1380_v17 = vadd.f32 %v1379_v48, %v1378_v59 }
 0x27b   : > { %v1389_v57 = vadd.f32 %v1388_v34, %v1387_v43  ;;  %v1381_v8 = vrot.slane %v1380_v17, 1 }
 0x27c   : > { %v1982_v24 = vpop.eup %1981 }
 0x27d   : > { %v1449_v38 = vmul.f32 %v1982_v24, %v1966_v21  ;;  %1985 = vrcp.f32 %v1389_v57  ;;  %v1382_v18 = vadd.f32 %v1381_v8, %v1380_v17 }
 0x27f   : > { %1483 = vst.msk [vmem:[%s2366_s10 + $0xe8] sm:$0xff] %vm845_vm1, %v1449_v38  ;;  %1987 = vrcp.f32 %v1382_v18 }
 0x280   : > { %v1984_v9 = vpop.eup %1983 }
 0x281   : > { %v1447_v10 = vmul.f32 %v1984_v9, %v1970_v55 }
 0x283   : > { %1482 = vst.msk [vmem:[%s2366_s10 + $0xe0] sm:$0xff] %vm845_vm1, %v1447_v10 }
 0x287   : > { %v1986_v2 = vpop.eup %1985 }
 0x288   : > { %v1453_v60 = vmul.f32 %v1986_v2, %v1974_v7 }
 0x289   : > { %v1988_v5 = vpop.eup %1987 }
 0x28a   : > { %1485 = vst.msk [vmem:[%s2366_s10 + $0xf8] sm:$0xff] %vm845_vm1, %v1453_v60  ;;  %v1451_v1 = vmul.f32 %v1988_v5, %v1978_v56 }
 0x28c   : > { %1484 = vst.msk [vmem:[%s2366_s10 + $0xf0] sm:$0xff] %vm845_vm1, %v1451_v1 }
 0x28d PF: > { %s13_s12 = sadd.s32 1, %s1996_s12  }
 0x28e   : > { %p10_p4 = scmp.ge.s32.totalorder %s13_s12, 4  }
 0x290   :  { %12 = sbr.rel (!%p10_p4) target bundleno = 1 (0x1), region = 62 }

</bundles_post_ra>
